<compile_context>
chip_gen: v5e
topology: v5e:2x2
jax: 0.10.0
libtpu: 0.0.40
codegen_flags: <defaults>
</compile_context>

<pallas_src>
import jax
import jax.numpy as jnp
from jax.experimental import pallas as pl
from jax.experimental.pallas import tpu as pltpu

# ---------------- synthetic (small) SMPL-H sizes ----------------
BATCH = 2
NUM_VERTS = 512            # real SMPL-H: 6890 (pad to 6912 = 54*128)
NUM_JOINTS = 52            # 1 root + 21 body + 30 hand joints (pose dim 156)
NUM_BETAS = 10             # matches num_betas=10 in the module spec
POSE_FEAT = (NUM_JOINTS - 1) * 9   # 459 pose-blend features
TILE_N = 768               # 3*V = 1536 -> grid of 2 even steps (v7x: 2 TCs)

# canonical SMPL-H kinematic tree (parent of each joint)
SMPLH_PARENTS = [-1, 0, 0, 0, 1, 2, 3, 4, 5, 6, 7, 8, 9, 9, 9, 12, 13, 14,
                 16, 17, 18, 19,
                 20, 22, 23, 20, 25, 26, 20, 28, 29, 20, 31, 32, 20, 34, 35,
                 21, 37, 38, 21, 40, 41, 21, 43, 44, 21, 46, 47, 21, 49, 50]


def _build_levels(parents):
    """Group joints by depth so the kinematic chain composes per level."""
    depth = [0] * len(parents)
    for i in range(1, len(parents)):
        depth[i] = depth[parents[i]] + 1
    levels = []
    for d in range(1, max(depth) + 1):
        ids = tuple(i for i in range(len(parents)) if depth[i] == d)
        pars = tuple(parents[i] for i in ids)
        levels.append((ids, pars))
    return levels


KIN_LEVELS = _build_levels(SMPLH_PARENTS)   # 11 levels instead of 52 steps


# ---------------- Pallas kernel 1: fused blendshapes + template bias ----------------
def _blend_kernel(betas_ref, pmap_ref, sdir_ref, pdir_ref, vt_ref,
                  naked_ref, tposed_ref):
    # betas_ref: (B, Kb) f32      sdir_ref: (Kb, tile_n) bf16
    # pmap_ref:  (B, Kp) f32      pdir_ref: (Kp, tile_n) bf16
    # vt_ref: (1, tile_n) f32     outputs: (B, tile_n) f32
    s = jnp.dot(betas_ref[...].astype(jnp.bfloat16), sdir_ref[...],
                preferred_element_type=jnp.float32)
    p = jnp.dot(pmap_ref[...].astype(jnp.bfloat16), pdir_ref[...],
                preferred_element_type=jnp.float32)
    naked = s + vt_ref[...]              # template bias fused in the epilogue
    naked_ref[...] = naked
    tposed_ref[...] = naked + p          # pose-blend fused in the epilogue


def fused_blendshapes(betas, pose_map, sdirs, pdirs, vt_flat, tile_n=TILE_N):
    """One streamed call: naked = vT + S@betas, tposed = naked + P@pose_map."""
    B, Kb = betas.shape
    Kp = pose_map.shape[1]
    N = sdirs.shape[1]
    assert N % tile_n == 0  # TODO(synk): pad 3V for real SMPL-H (20670)
    return pl.pallas_call(
        _blend_kernel,
        out_shape=(jax.ShapeDtypeStruct((B, N), jnp.float32),
                   jax.ShapeDtypeStruct((B, N), jnp.float32)),
        grid=(N // tile_n,),
        in_specs=[pl.BlockSpec((B, Kb), lambda n: (0, 0)),
                  pl.BlockSpec((B, Kp), lambda n: (0, 0)),
                  pl.BlockSpec((Kb, tile_n), lambda n: (0, n)),
                  pl.BlockSpec((Kp, tile_n), lambda n: (0, n)),
                  pl.BlockSpec((1, tile_n), lambda n: (0, n))],
        out_specs=(pl.BlockSpec((B, tile_n), lambda n: (0, n)),
                   pl.BlockSpec((B, tile_n), lambda n: (0, n))),
        compiler_params=pltpu.CompilerParams(
            dimension_semantics=("parallel",)),
    )(betas, pose_map, sdirs, pdirs, vt_flat)


# ---------------- Pallas kernel 2: lane-dense LBS skinning ----------------
def _skin_kernel(wt_ref, at_ref, t_ref, o_ref):
    # wt_ref: (NJ, V) bf16   at_ref: (1, 16, NJ) f32
    # t_ref / o_ref: (1, 3, V) f32  -- V in lanes (lane-dense load/store)
    T = jnp.dot(at_ref[0], wt_ref[...].astype(jnp.float32),
                preferred_element_type=jnp.float32)           # (16, V)
    t = t_ref[0]                                              # (3, V)
    x, y, z = t[0:1, :], t[1:2, :], t[2:3, :]
    vx = T[0:1] * x + T[1:2] * y + T[2:3] * z + T[3:4]
    vy = T[4:5] * x + T[5:6] * y + T[6:7] * z + T[7:8]
    vz = T[8:9] * x + T[9:10] * y + T[10:11] * z + T[11:12]
    o_ref[0] = jnp.concatenate([vx, vy, vz], axis=0)          # (3, V) store


def pallas_lbs(weights_t, A_t, tposed_cv):
    """Per-batch: T_v = sum_j w[v,j] A[b,j]; verts = T_v @ [x,y,z,1]."""
    NJ, V = weights_t.shape
    B = A_t.shape[0]
    return pl.pallas_call(
        _skin_kernel,
        out_shape=jax.ShapeDtypeStruct((B, 3, V), jnp.float32),
        grid=(B,),
        in_specs=[pl.BlockSpec((NJ, V), lambda b: (0, 0)),    # stays resident
                  pl.BlockSpec((1, 16, NJ), lambda b: (b, 0, 0)),
                  pl.BlockSpec((1, 3, V), lambda b: (b, 0, 0))],
        out_specs=pl.BlockSpec((1, 3, V), lambda b: (b, 0, 0)),
        compiler_params=pltpu.CompilerParams(
            dimension_semantics=("parallel",)),
    )(weights_t, A_t, tposed_cv)


# ---------------- plain-JAX glue (tiny per-joint math) ----------------
def rodrigues(pose_vecs):
    """Axis-angle [B, NJ, 3] -> rotation matrices [B, NJ, 3, 3]."""
    angle = jnp.sqrt(jnp.sum(pose_vecs ** 2, axis=-1, keepdims=True) + 1e-16)
    axis = pose_vecs / angle
    s = jnp.sin(angle)[..., None]
    c = jnp.cos(angle)[..., None]
    ax, ay, az = axis[..., 0], axis[..., 1], axis[..., 2]
    zeros = jnp.zeros_like(ax)
    K = jnp.stack([zeros, -az, ay,
                   az, zeros, -ax,
                   -ay, ax, zeros], axis=-1).reshape(pose_vecs.shape[:-1] + (3, 3))
    eye = jnp.eye(3, dtype=pose_vecs.dtype)
    return eye + s * K + (1.0 - c) * jnp.matmul(K, K)


def global_rigid_transform(R, J, parents):
    """Level-batched forward kinematics -> posed joints [B,NJ,3], rel transforms [B,NJ,4,4]."""
    B, NJ = R.shape[0], R.shape[1]
    parent_idx = jnp.asarray(parents[1:], dtype=jnp.int32)
    J_rel = jnp.concatenate([J[:, :1], J[:, 1:] - J[:, parent_idx]], axis=1)
    bottom = jnp.broadcast_to(jnp.array([0., 0., 0., 1.], R.dtype), (B, NJ, 1, 4))
    T_local = jnp.concatenate(
        [jnp.concatenate([R, J_rel[..., None]], axis=-1), bottom], axis=-2)
    T = T_local                                   # root local == root global
    for ids, pars in KIN_LEVELS:                  # 11 levels, batched 4x4 matmuls
        ids_a = jnp.asarray(ids, dtype=jnp.int32)
        pars_a = jnp.asarray(pars, dtype=jnp.int32)
        comp = jnp.einsum('bjmn,bjnk->bjmk', T[:, pars_a], T_local[:, ids_a])
        T = T.at[:, ids_a].set(comp)
    posed_joints = T[:, :, :3, 3]
    Jh = jnp.concatenate([J, jnp.zeros_like(J[..., :1])], axis=-1)   # [B,NJ,4]
    corr = jnp.einsum('bjmn,bjn->bjm', T, Jh)
    A = T - jnp.concatenate(
        [jnp.zeros(T.shape[:-1] + (3,), T.dtype), corr[..., None]], axis=-1)
    return posed_joints, A


# ---------------- forward (mirrors batch_SMPLH.forward) ----------------
@jax.jit
def smplh_forward(betas_in, pose, trans, scale, consts):
    B = pose.shape[0]
    V = consts['weights_t'].shape[1]

    # betas.repeat(pose.shape[0], 1) in the torch module
    betas = jnp.broadcast_to(betas_in, (B, betas_in.shape[-1]))

    # pose -> per-joint rotations and pose-blend feature (tiny, plain JAX)
    R = rodrigues(pose.reshape(B, NUM_JOINTS, 3))
    pose_map = (R[:, 1:] - jnp.eye(3, dtype=R.dtype)).reshape(B, POSE_FEAT)

    # (1+3) fused shape + pose blendshapes + template bias, one Pallas stream
    naked_flat, tposed_flat = fused_blendshapes(
        betas, pose_map, consts['shapedirs_cm'], consts['posedirs_cm'],
        consts['v_template_cm'])
    naked_cv = naked_flat.reshape(B, 3, V)
    tposed_cv = tposed_flat.reshape(B, 3, V)

    # (2) joint regression: 52xV GEMV -- too small for Pallas, plain XLA
    Jloc = jnp.einsum('jv,bcv->bjc', consts['J_regressor'], naked_cv)

    # (4) kinematic chain (level-batched 4x4 composes)
    posed_joints, A = global_rigid_transform(R, Jloc, SMPLH_PARENTS)
    A_t = A.reshape(B, NUM_JOINTS, 16).transpose(0, 2, 1)      # [B, 16, NJ]

    # (5) lane-dense LBS skinning (Pallas)
    verts_cv = pallas_lbs(consts['weights_t'], A_t, tposed_cv)

    verts = verts_cv.transpose(0, 2, 1)
    tposed = tposed_cv.transpose(0, 2, 1)
    naked = naked_cv.transpose(0, 2, 1)

    # (6) scale / translation / centering (center_idx=0)
    # TODO(synk): exact scale+centering behaviour of the private SMPLH_Layer is
    # unavailable; follows the public smplpytorch convention (center on joint 0
    # when trans==0, else translate; scale applied to verts/joints).
    verts = verts * scale
    jtr = posed_joints * scale
    use_trans = jnp.linalg.norm(trans) > 0
    center = jtr[:, 0:1, :]
    verts_out = jnp.where(use_trans, verts + trans[:, None, :], verts - center)
    jtr_out = jnp.where(use_trans, jtr + trans[:, None, :], jtr - center)
    return verts_out, jtr_out, tposed, naked


# ---------------- deterministic parameter / model-constant init ----------------
def init_all(key):
    ks = jax.random.split(key, 8)
    betas = 0.1 * jax.random.normal(ks[0], (1, NUM_BETAS), jnp.float32)
    pose = 0.1 * jax.random.normal(ks[1], (BATCH, NUM_JOINTS * 3), jnp.float32)
    trans = 0.1 * jax.random.normal(ks[2], (BATCH, 3), jnp.float32)
    scale = jnp.asarray(1.0, jnp.float32)

    # synthetic SMPL-H model constants (deterministic, not a checkpoint load)
    v_template = jax.random.normal(ks[3], (NUM_VERTS, 3), jnp.float32)
    shapedirs = 0.01 * jax.random.normal(ks[4], (NUM_BETAS, NUM_VERTS, 3), jnp.float32)
    posedirs = 0.01 * jax.random.normal(ks[5], (POSE_FEAT, NUM_VERTS, 3), jnp.float32)
    J_regressor = jax.nn.softmax(
        jax.random.normal(ks[6], (NUM_JOINTS, NUM_VERTS), jnp.float32), axis=-1)
    weights = jax.nn.softmax(
        jax.random.normal(ks[7], (NUM_VERTS, NUM_JOINTS), jnp.float32), axis=-1)

    # one-time channel-major relayout (x-plane | y-plane | z-plane) + bf16 cast
    # of the HBM-bound weight streams; accumulation stays f32 in the kernels.
    consts = {
        'v_template_cm': v_template.T.reshape(1, 3 * NUM_VERTS),
        'shapedirs_cm': shapedirs.transpose(0, 2, 1)
                        .reshape(NUM_BETAS, 3 * NUM_VERTS).astype(jnp.bfloat16),
        'posedirs_cm': posedirs.transpose(0, 2, 1)
                       .reshape(POSE_FEAT, 3 * NUM_VERTS).astype(jnp.bfloat16),
        'J_regressor': J_regressor,
        'weights_t': weights.T.astype(jnp.bfloat16),           # [NJ, V]
    }
    return betas, pose, trans, scale, consts


if __name__ == "__main__":
    key = jax.random.PRNGKey(0)
    betas, pose, trans, scale, consts = init_all(key)
    verts, jtr, tposed, naked = smplh_forward(betas, pose, trans, scale, consts)
    jax.block_until_ready((verts, jtr, tposed, naked))
    assert verts.shape == (BATCH, NUM_VERTS, 3)
    assert jtr.shape == (BATCH, NUM_JOINTS, 3)
    assert tposed.shape == (BATCH, NUM_VERTS, 3)
    assert naked.shape == (BATCH, NUM_VERTS, 3)
    assert all(bool(jnp.all(jnp.isfinite(t))) for t in (verts, jtr, tposed, naked))
    print("KERNEL_OK")
</pallas_src>

<mosaic_0001>
module attributes {stable_mosaic.version = 11 : i64} {
  func.func @_blend_kernel(%arg0: i32, %arg1: memref<2x10xf32, #tpu.memory_space<vmem>>, %arg2: memref<2x459xf32, #tpu.memory_space<vmem>>, %arg3: memref<10x768xbf16, #tpu.memory_space<vmem>>, %arg4: memref<459x768xbf16, #tpu.memory_space<vmem>>, %arg5: memref<1x768xf32, #tpu.memory_space<vmem>>, %arg6: memref<2x768xf32, #tpu.memory_space<vmem>>, %arg7: memref<2x768xf32, #tpu.memory_space<vmem>>) attributes {dimension_semantics = [#tpu.dimension_semantics<parallel>], iteration_bounds = array<i64: 2>, scalar_prefetch = 0 : i64, scratch_operands = 0 : i64, tpu.core_type = #tpu.core_type<tc>, window_params = [{pipeline_mode = #tpu.pipeline_mode<synchronous>, transform_indices = @transform_0, window_bounds = array<i64: 2, 10>}, {pipeline_mode = #tpu.pipeline_mode<synchronous>, transform_indices = @transform_1, window_bounds = array<i64: 2, 459>}, {transform_indices = @transform_2, window_bounds = array<i64: 10, 768>}, {transform_indices = @transform_3, window_bounds = array<i64: 459, 768>}, {transform_indices = @transform_4, window_bounds = array<i64: 1, 768>}, {transform_indices = @transform_5, window_bounds = array<i64: 2, 768>}, {transform_indices = @transform_6, window_bounds = array<i64: 2, 768>}]} {
    %c0 = arith.constant 0 : index
    %c0_0 = arith.constant 0 : index
    %0 = vector.load %arg1[%c0, %c0_0] : memref<2x10xf32, #tpu.memory_space<vmem>>, vector<2x10xf32>
    %1 = arith.truncf %0 : vector<2x10xf32> to vector<2x10xbf16>
    %c0_1 = arith.constant 0 : index
    %c0_2 = arith.constant 0 : index
    %2 = vector.load %arg3[%c0_1, %c0_2] : memref<10x768xbf16, #tpu.memory_space<vmem>>, vector<10x768xbf16>
    %cst = arith.constant dense<0.000000e+00> : vector<2x768xf32>
    %3 = tpu.matmul %1, %2, %cst {dimension_numbers = #tpu.dot_dimension_numbers<[1], [0], [0], [1], [0, 0, 1, 1], [], []>} : vector<2x10xbf16>, vector<10x768xbf16>, vector<2x768xf32> -> vector<2x768xf32>
    %c0_3 = arith.constant 0 : index
    %c0_4 = arith.constant 0 : index
    %4 = vector.load %arg2[%c0_3, %c0_4] : memref<2x459xf32, #tpu.memory_space<vmem>>, vector<2x459xf32>
    %5 = arith.truncf %4 : vector<2x459xf32> to vector<2x459xbf16>
    %c0_5 = arith.constant 0 : index
    %c0_6 = arith.constant 0 : index
    %6 = vector.load %arg4[%c0_5, %c0_6] : memref<459x768xbf16, #tpu.memory_space<vmem>>, vector<459x768xbf16>
    %cst_7 = arith.constant dense<0.000000e+00> : vector<2x768xf32>
    %7 = tpu.matmul %5, %6, %cst_7 {dimension_numbers = #tpu.dot_dimension_numbers<[1], [0], [0], [1], [0, 0, 1, 1], [], []>} : vector<2x459xbf16>, vector<459x768xbf16>, vector<2x768xf32> -> vector<2x768xf32>
    %c0_8 = arith.constant 0 : index
    %c0_9 = arith.constant 0 : index
    %8 = vector.load %arg5[%c0_8, %c0_9] : memref<1x768xf32, #tpu.memory_space<vmem>>, vector<1x768xf32>
    %9 = vector.broadcast %8 : vector<1x768xf32> to vector<2x768xf32>
    %10 = arith.addf %3, %9 : vector<2x768xf32>
    %c0_10 = arith.constant 0 : index
    %c0_11 = arith.constant 0 : index
    %11 = vector.load %arg6[%c0_10, %c0_11] : memref<2x768xf32, #tpu.memory_space<vmem>>, vector<2x768xf32>
    tpu.vector_store %arg6[%c0_10, %c0_11], %10 {strides = array<i32>} : memref<2x768xf32, #tpu.memory_space<vmem>>, vector<2x768xf32>,
    %12 = arith.addf %10, %7 : vector<2x768xf32>
    %c0_12 = arith.constant 0 : index
    %c0_13 = arith.constant 0 : index
    %13 = vector.load %arg7[%c0_12, %c0_13] : memref<2x768xf32, #tpu.memory_space<vmem>>, vector<2x768xf32>
    tpu.vector_store %arg7[%c0_12, %c0_13], %12 {strides = array<i32>} : memref<2x768xf32, #tpu.memory_space<vmem>>, vector<2x768xf32>,
    return
  }
  func.func @transform_0(%arg0: i32) -> (i32, i32) {
    %c0_i32 = arith.constant 0 : i32
    %c0_i32_0 = arith.constant 0 : i32
    %c0_i32_1 = arith.constant 0 : i32
    return %c0_i32, %c0_i32_0 : i32, i32
  }
  func.func @transform_1(%arg0: i32) -> (i32, i32) {
    %c0_i32 = arith.constant 0 : i32
    %c0_i32_0 = arith.constant 0 : i32
    %c0_i32_1 = arith.constant 0 : i32
    return %c0_i32, %c0_i32_0 : i32, i32
  }
  func.func @transform_2(%arg0: i32) -> (i32, i32) {
    %c0_i32 = arith.constant 0 : i32
    %c0_i32_0 = arith.constant 0 : i32
    return %c0_i32, %arg0 : i32, i32
  }
  func.func @transform_3(%arg0: i32) -> (i32, i32) {
    %c0_i32 = arith.constant 0 : i32
    %c0_i32_0 = arith.constant 0 : i32
    return %c0_i32, %arg0 : i32, i32
  }
  func.func @transform_4(%arg0: i32) -> (i32, i32) {
    %c0_i32 = arith.constant 0 : i32
    %c0_i32_0 = arith.constant 0 : i32
    return %c0_i32, %arg0 : i32, i32
  }
  func.func @transform_5(%arg0: i32) -> (i32, i32) {
    %c0_i32 = arith.constant 0 : i32
    %c0_i32_0 = arith.constant 0 : i32
    return %c0_i32, %arg0 : i32, i32
  }
  func.func @transform_6(%arg0: i32) -> (i32, i32) {
    %c0_i32 = arith.constant 0 : i32
    %c0_i32_0 = arith.constant 0 : i32
    return %c0_i32, %arg0 : i32, i32
  }
}

module attributes {stable_mosaic.version = 11 : i64} {
  func.func @_skin_kernel(%arg0: i32, %arg1: memref<52x512xbf16, #tpu.memory_space<vmem>>, %arg2: memref<1x16x52xf32, #tpu.memory_space<vmem>>, %arg3: memref<1x3x512xf32, #tpu.memory_space<vmem>>, %arg4: memref<1x3x512xf32, #tpu.memory_space<vmem>>) attributes {dimension_semantics = [#tpu.dimension_semantics<parallel>], iteration_bounds = array<i64: 2>, scalar_prefetch = 0 : i64, scratch_operands = 0 : i64, tpu.core_type = #tpu.core_type<tc>, window_params = [{pipeline_mode = #tpu.pipeline_mode<synchronous>, transform_indices = @transform_0, window_bounds = array<i64: 52, 512>}, {transform_indices = @transform_1, window_bounds = array<i64: 1, 16, 52>}, {transform_indices = @transform_2, window_bounds = array<i64: 1, 3, 512>}, {transform_indices = @transform_3, window_bounds = array<i64: 1, 3, 512>}]} {
    %c0 = arith.constant 0 : index
    %c0_0 = arith.constant 0 : index
    %c0_1 = arith.constant 0 : index
    %0 = vector.load %arg2[%c0, %c0_0, %c0_1] : memref<1x16x52xf32, #tpu.memory_space<vmem>>, vector<1x16x52xf32>
    %1 = vector.shape_cast %0 : vector<1x16x52xf32> to vector<16x52xf32>
    %c0_2 = arith.constant 0 : index
    %c0_3 = arith.constant 0 : index
    %2 = vector.load %arg1[%c0_2, %c0_3] : memref<52x512xbf16, #tpu.memory_space<vmem>>, vector<52x512xbf16>
    %3 = arith.extf %2 : vector<52x512xbf16> to vector<52x512xf32>
    %cst = arith.constant dense<0.000000e+00> : vector<16x512xf32>
    %4 = tpu.matmul %1, %3, %cst {dimension_numbers = #tpu.dot_dimension_numbers<[1], [0], [0], [1], [0, 0, 1, 1], [], []>} : vector<16x52xf32>, vector<52x512xf32>, vector<16x512xf32> -> vector<16x512xf32>
    %c0_4 = arith.constant 0 : index
    %c0_5 = arith.constant 0 : index
    %c0_6 = arith.constant 0 : index
    %5 = vector.load %arg3[%c0_4, %c0_5, %c0_6] : memref<1x3x512xf32, #tpu.memory_space<vmem>>, vector<1x3x512xf32>
    %6 = vector.shape_cast %5 : vector<1x3x512xf32> to vector<3x512xf32>
    %7 = vector.extract_strided_slice %6 {offsets = [0, 0], sizes = [1, 512], strides = [1, 1]} : vector<3x512xf32> to vector<1x512xf32>
    %8 = vector.extract_strided_slice %6 {offsets = [1, 0], sizes = [1, 512], strides = [1, 1]} : vector<3x512xf32> to vector<1x512xf32>
    %9 = vector.extract_strided_slice %6 {offsets = [2, 0], sizes = [1, 512], strides = [1, 1]} : vector<3x512xf32> to vector<1x512xf32>
    %10 = vector.extract_strided_slice %4 {offsets = [0, 0], sizes = [1, 512], strides = [1, 1]} : vector<16x512xf32> to vector<1x512xf32>
    %11 = arith.mulf %10, %7 : vector<1x512xf32>
    %12 = vector.extract_strided_slice %4 {offsets = [1, 0], sizes = [1, 512], strides = [1, 1]} : vector<16x512xf32> to vector<1x512xf32>
    %13 = arith.mulf %12, %8 : vector<1x512xf32>
    %14 = arith.addf %11, %13 : vector<1x512xf32>
    %15 = vector.extract_strided_slice %4 {offsets = [2, 0], sizes = [1, 512], strides = [1, 1]} : vector<16x512xf32> to vector<1x512xf32>
    %16 = arith.mulf %15, %9 : vector<1x512xf32>
    %17 = arith.addf %14, %16 : vector<1x512xf32>
    %18 = vector.extract_strided_slice %4 {offsets = [3, 0], sizes = [1, 512], strides = [1, 1]} : vector<16x512xf32> to vector<1x512xf32>
    %19 = arith.addf %17, %18 : vector<1x512xf32>
    %20 = vector.extract_strided_slice %4 {offsets = [4, 0], sizes = [1, 512], strides = [1, 1]} : vector<16x512xf32> to vector<1x512xf32>
    %21 = arith.mulf %20, %7 : vector<1x512xf32>
    %22 = vector.extract_strided_slice %4 {offsets = [5, 0], sizes = [1, 512], strides = [1, 1]} : vector<16x512xf32> to vector<1x512xf32>
    %23 = arith.mulf %22, %8 : vector<1x512xf32>
    %24 = arith.addf %21, %23 : vector<1x512xf32>
    %25 = vector.extract_strided_slice %4 {offsets = [6, 0], sizes = [1, 512], strides = [1, 1]} : vector<16x512xf32> to vector<1x512xf32>
    %26 = arith.mulf %25, %9 : vector<1x512xf32>
    %27 = arith.addf %24, %26 : vector<1x512xf32>
    %28 = vector.extract_strided_slice %4 {offsets = [7, 0], sizes = [1, 512], strides = [1, 1]} : vector<16x512xf32> to vector<1x512xf32>
    %29 = arith.addf %27, %28 : vector<1x512xf32>
    %30 = vector.extract_strided_slice %4 {offsets = [8, 0], sizes = [1, 512], strides = [1, 1]} : vector<16x512xf32> to vector<1x512xf32>
    %31 = arith.mulf %30, %7 : vector<1x512xf32>
    %32 = vector.extract_strided_slice %4 {offsets = [9, 0], sizes = [1, 512], strides = [1, 1]} : vector<16x512xf32> to vector<1x512xf32>
    %33 = arith.mulf %32, %8 : vector<1x512xf32>
    %34 = arith.addf %31, %33 : vector<1x512xf32>
    %35 = vector.extract_strided_slice %4 {offsets = [10, 0], sizes = [1, 512], strides = [1, 1]} : vector<16x512xf32> to vector<1x512xf32>
    %36 = arith.mulf %35, %9 : vector<1x512xf32>
    %37 = arith.addf %34, %36 : vector<1x512xf32>
    %38 = vector.extract_strided_slice %4 {offsets = [11, 0], sizes = [1, 512], strides = [1, 1]} : vector<16x512xf32> to vector<1x512xf32>
    %39 = arith.addf %37, %38 : vector<1x512xf32>
    %40 = tpu.concatenate %19, %29, %39 in 0 : vector<1x512xf32>, vector<1x512xf32>, vector<1x512xf32> -> vector<3x512xf32>
    %c0_7 = arith.constant 0 : index
    %c0_8 = arith.constant 0 : index
    %c0_9 = arith.constant 0 : index
    %41 = vector.load %arg4[%c0_7, %c0_8, %c0_9] : memref<1x3x512xf32, #tpu.memory_space<vmem>>, vector<1x3x512xf32>
    %42 = vector.shape_cast %41 : vector<1x3x512xf32> to vector<3x512xf32>
    %43 = vector.shape_cast %40 : vector<3x512xf32> to vector<1x3x512xf32>
    tpu.vector_store %arg4[%c0_7, %c0_8, %c0_9], %43 {strides = array<i32>} : memref<1x3x512xf32, #tpu.memory_space<vmem>>, vector<1x3x512xf32>,
    return
  }
  func.func @transform_0(%arg0: i32) -> (i32, i32) {
    %c0_i32 = arith.constant 0 : i32
    %c0_i32_0 = arith.constant 0 : i32
    %c0_i32_1 = arith.constant 0 : i32
    return %c0_i32, %c0_i32_0 : i32, i32
  }
  func.func @transform_1(%arg0: i32) -> (i32, i32, i32) {
    %c0_i32 = arith.constant 0 : i32
    %c0_i32_0 = arith.constant 0 : i32
    %c0_i32_1 = arith.constant 0 : i32
    return %arg0, %c0_i32, %c0_i32_0 : i32, i32, i32
  }
  func.func @transform_2(%arg0: i32) -> (i32, i32, i32) {
    %c0_i32 = arith.constant 0 : i32
    %c0_i32_0 = arith.constant 0 : i32
    %c0_i32_1 = arith.constant 0 : i32
    return %arg0, %c0_i32, %c0_i32_0 : i32, i32, i32
  }
  func.func @transform_3(%arg0: i32) -> (i32, i32, i32) {
    %c0_i32 = arith.constant 0 : i32
    %c0_i32_0 = arith.constant 0 : i32
    %c0_i32_1 = arith.constant 0 : i32
    return %arg0, %c0_i32, %c0_i32_0 : i32, i32, i32
  }
}

</mosaic_0001>

<bundles_post_ra>
// kernel: smplh_forward.2
= control target key start
LH: loop header
LB: loop body
LE: loop exit
PB: predicated region body
PF: predicated region fallthrough
CT: control target
= control target key end

     0   :  { %s3424_s21 = smov 0   ;;  %s3426_s22 = smov 0   ;;  %s4299_s0 = inlined_call_operand.vmem [shape: f32[2,10], index: 0, kind: input, shape index: {}]   ;;  %s4300_s1 = inlined_call_operand.vmem [shape: f32[2,459], index: 1, kind: input, shape index: {}]   ;;  %s4301_s2 = inlined_call_operand.vmem [shape: bf16[10,1536], index: 2, kind: input, shape index: {}]   ;;  %s4302_s3 = inlined_call_operand.vmem [shape: bf16[459,1536], index: 3, kind: input, shape index: {}]   ;;  %s4303_s4 = inlined_call_operand.vmem [shape: f32[1,1536], index: 4, kind: input, shape index: {}]   ;;  %s4304_s5 = inlined_call_operand.vmem [shape: f32[2,1536], index: 5, kind: output, shape index: {0}]   ;;  %s4305_s6 = inlined_call_operand.vmem [shape: f32[2,1536], index: 6, kind: output, shape index: {1}]  }
   0x1   :  { %s3428_s23 = smov 0  }
   0x2 LB: > { %s2410_s24 = sadd.s32 4294967295, %s3386_s23   ;;  %s3441_s25 = sadd.s32 1, %s3386_s23   ;;  %s3386_s23 = sphi %s3428_s23, %s4309_s23   ;;  %s3382_s22 = sphi %s3426_s22, %s4308_s22   ;;  %s3378_s21 = sphi %s3424_s21, %s4307_s21  }
   0x3   : > { %s63_s26 = ssub.s32 %s3386_s23, %s3441_s25  ;;  %s66_s27 = sadd.s32 1, %s3382_s22 }
   0x4   : > { %p64_p0 = scmp.eq.s32.totalorder %s63_s26, 0  ;;  %p73_p1 = scmp.ne.s32.totalorder %s3382_s22, %s3378_s21 }
   0x5   : > { %p74_p2 = scmp.eq.s32.totalorder %s3386_s23, 0  ;;  %p2413_p4 = scmp.ge.s32.totalorder %s3386_s23, 2 }
   0x6   : > { %s3450_s28 = scalar_select %p64_p0, %s3382_s22, %s66_s27  }
   0x7   : > { %p3452_p3 = por %p74_p2, %p73_p1  ;;  %209 = sbr.rel (%p2413_p4) target bundleno = 202 (0xca), region = 24 }
   0xc   : > { %212 = sbr.rel (!%p3452_p3) target bundleno = 23 (0x17), region = 28  ;;  %s214_s30 = sand.u32 (%p3452_p3), 1, %s3382_s22  }
   0xd   : > { %s3153_s7 = smul.u32 (%p3452_p3), 24, %s3386_s23 }
   0xe   : > { %s3335_s8 = smul.u32 (%p3452_p3), 48, %s214_s30 }
   0xf   : > { %s219_s11 = scalar_lea.vmem (%p3452_p3), %s4301_s2, %s3153_s7 }
  0x10   : > { %v232_v0 = vld [vmem:[%s219_s11] sm:$0xff] (%p3452_p3)  ;;  %v234_v1 = vld [vmem:[%s219_s11 + $0x8] sm:$0xff] (%p3452_p3)  ;;  %v236_v2 = vld [vmem:[%s219_s11 + $0x10] sm:$0xff] (%p3452_p3)  ;;  %s216_s12 = scalar_lea.vmem (%p3452_p3), [#allocation2], %s3335_s8 }
  0x11   : > { %233 = vst [vmem:[%s216_s12] sm:$0xff] %v232_v0  ;;  %v238_v3 = vld [vmem:[%s219_s11 + $0x30] sm:$0xff]  ;;  %v240_v4 = vld [vmem:[%s219_s11 + $0x38] sm:$0xff]  ;;  %v242_v5 = vld [vmem:[%s219_s11 + $0x40] sm:$0xff] }
  0x12   : > { %235 = vst [vmem:[%s216_s12 + $0x8] sm:$0xff] %v234_v1 }
  0x13   : > { %237 = vst [vmem:[%s216_s12 + $0x10] sm:$0xff] %v236_v2 }
  0x14   : > { %239 = vst [vmem:[%s216_s12 + $0x18] sm:$0xff] %v238_v3 }
  0x15   : > { %241 = vst [vmem:[%s216_s12 + $0x20] sm:$0xff] %v240_v4 }
  0x16   : > { %243 = vst [vmem:[%s216_s12 + $0x28] sm:$0xff] %v242_v5 }
  0x17 PF: > { %249 = sbr.rel (!%p3452_p3) target bundleno = 202 (0xca), region = 51  ;;  %s251_s13 = sand.u32 (%p3452_p3), 1, %s3382_s22  }
  0x18   : > { %s3154_s14 = smul.u32 (%p3452_p3), 24, %s3386_s23 }
  0x19   : > { %s3336_s15 = smul.u32 (%p3452_p3), 1392, %s251_s13 }
  0x1a   : > { %s3471_s18 = scalar_lea.vmem (%p3452_p3), %s4302_s3, %s3154_s14 }
  0x1b   : > { %v269_v6 = vld [vmem:[%s3471_s18] sm:$0xff] (%p3452_p3)  ;;  %v271_v7 = vld [vmem:[%s3471_s18 + $0x8] sm:$0xff] (%p3452_p3)  ;;  %v273_v8 = vld [vmem:[%s3471_s18 + $0x10] sm:$0xff] (%p3452_p3)  ;;  %s3476_s19 = scalar_lea.vmem (%p3452_p3), [#allocation3], %s3336_s15 }
  0x1c   : > { %270 = vst [vmem:[%s3476_s19] sm:$0xff] %v269_v6  ;;  %v275_v9 = vld [vmem:[%s3471_s18 + $0x30] sm:$0xff]  ;;  %v277_v10 = vld [vmem:[%s3471_s18 + $0x38] sm:$0xff]  ;;  %v279_v11 = vld [vmem:[%s3471_s18 + $0x40] sm:$0xff] }
  0x1d   : > { %272 = vst [vmem:[%s3476_s19 + $0x8] sm:$0xff] %v271_v7  ;;  %v281_v12 = vld [vmem:[%s3471_s18 + $0x60] sm:$0xff]  ;;  %v283_v13 = vld [vmem:[%s3471_s18 + $0x68] sm:$0xff]  ;;  %v285_v14 = vld [vmem:[%s3471_s18 + $0x70] sm:$0xff] }
  0x1e   : > { %274 = vst [vmem:[%s3476_s19 + $0x10] sm:$0xff] %v273_v8  ;;  %v287_v15 = vld [vmem:[%s3471_s18 + $0x90] sm:$0xff]  ;;  %v289_v16 = vld [vmem:[%s3471_s18 + $0x98] sm:$0xff]  ;;  %v291_v17 = vld [vmem:[%s3471_s18 + $0xa0] sm:$0xff] }
  0x1f   : > { %276 = vst [vmem:[%s3476_s19 + $0x18] sm:$0xff] %v275_v9  ;;  %v293_v18 = vld [vmem:[%s3471_s18 + $0xc0] sm:$0xff]  ;;  %v295_v19 = vld [vmem:[%s3471_s18 + $0xc8] sm:$0xff]  ;;  %v297_v20 = vld [vmem:[%s3471_s18 + $0xd0] sm:$0xff] }
  0x20   : > { %278 = vst [vmem:[%s3476_s19 + $0x20] sm:$0xff] %v277_v10  ;;  %v299_v21 = vld [vmem:[%s3471_s18 + $0xf0] sm:$0xff]  ;;  %v301_v22 = vld [vmem:[%s3471_s18 + $0xf8] sm:$0xff]  ;;  %v303_v23 = vld [vmem:[%s3471_s18 + $0x100] sm:$0xff] }
  0x21   : > { %280 = vst [vmem:[%s3476_s19 + $0x28] sm:$0xff] %v279_v11  ;;  %v305_v24 = vld [vmem:[%s3471_s18 + $0x120] sm:$0xff]  ;;  %v307_v25 = vld [vmem:[%s3471_s18 + $0x128] sm:$0xff]  ;;  %v309_v26 = vld [vmem:[%s3471_s18 + $0x130] sm:$0xff] }
  0x22   : > { %282 = vst [vmem:[%s3476_s19 + $0x30] sm:$0xff] %v281_v12  ;;  %v311_v27 = vld [vmem:[%s3471_s18 + $0x150] sm:$0xff]  ;;  %v313_v28 = vld [vmem:[%s3471_s18 + $0x158] sm:$0xff]  ;;  %v315_v29 = vld [vmem:[%s3471_s18 + $0x160] sm:$0xff] }
  0x23   : > { %284 = vst [vmem:[%s3476_s19 + $0x38] sm:$0xff] %v283_v13  ;;  %v317_v30 = vld [vmem:[%s3471_s18 + $0x180] sm:$0xff]  ;;  %v319_v31 = vld [vmem:[%s3471_s18 + $0x188] sm:$0xff]  ;;  %v321_v32 = vld [vmem:[%s3471_s18 + $0x190] sm:$0xff] }
  0x24   : > { %286 = vst [vmem:[%s3476_s19 + $0x40] sm:$0xff] %v285_v14  ;;  %v323_v33 = vld [vmem:[%s3471_s18 + $0x1b0] sm:$0xff]  ;;  %v325_v34 = vld [vmem:[%s3471_s18 + $0x1b8] sm:$0xff]  ;;  %v327_v35 = vld [vmem:[%s3471_s18 + $0x1c0] sm:$0xff] }
  0x25   : > { %288 = vst [vmem:[%s3476_s19 + $0x48] sm:$0xff] %v287_v15  ;;  %v329_v36 = vld [vmem:[%s3471_s18 + $0x1e0] sm:$0xff]  ;;  %v331_v37 = vld [vmem:[%s3471_s18 + $0x1e8] sm:$0xff]  ;;  %v333_v38 = vld [vmem:[%s3471_s18 + $0x1f0] sm:$0xff] }
  0x26   : > { %290 = vst [vmem:[%s3476_s19 + $0x50] sm:$0xff] %v289_v16  ;;  %v335_v39 = vld [vmem:[%s3471_s18 + $0x210] sm:$0xff]  ;;  %v337_v40 = vld [vmem:[%s3471_s18 + $0x218] sm:$0xff]  ;;  %v339_v41 = vld [vmem:[%s3471_s18 + $0x220] sm:$0xff] }
  0x27   : > { %292 = vst [vmem:[%s3476_s19 + $0x58] sm:$0xff] %v291_v17  ;;  %v341_v42 = vld [vmem:[%s3471_s18 + $0x240] sm:$0xff]  ;;  %v343_v43 = vld [vmem:[%s3471_s18 + $0x248] sm:$0xff]  ;;  %v345_v44 = vld [vmem:[%s3471_s18 + $0x250] sm:$0xff] }
  0x28   : > { %294 = vst [vmem:[%s3476_s19 + $0x60] sm:$0xff] %v293_v18  ;;  %v347_v45 = vld [vmem:[%s3471_s18 + $0x270] sm:$0xff]  ;;  %v349_v46 = vld [vmem:[%s3471_s18 + $0x278] sm:$0xff]  ;;  %v351_v47 = vld [vmem:[%s3471_s18 + $0x280] sm:$0xff] }
  0x29   : > { %296 = vst [vmem:[%s3476_s19 + $0x68] sm:$0xff] %v295_v19  ;;  %v353_v48 = vld [vmem:[%s3471_s18 + $0x2a0] sm:$0xff]  ;;  %v355_v49 = vld [vmem:[%s3471_s18 + $0x2a8] sm:$0xff]  ;;  %v357_v50 = vld [vmem:[%s3471_s18 + $0x2b0] sm:$0xff] }
  0x2a   : > { %298 = vst [vmem:[%s3476_s19 + $0x70] sm:$0xff] %v297_v20  ;;  %v359_v51 = vld [vmem:[%s3471_s18 + $0x2d0] sm:$0xff]  ;;  %v361_v52 = vld [vmem:[%s3471_s18 + $0x2d8] sm:$0xff]  ;;  %v363_v53 = vld [vmem:[%s3471_s18 + $0x2e0] sm:$0xff] }
  0x2b   : > { %300 = vst [vmem:[%s3476_s19 + $0x78] sm:$0xff] %v299_v21  ;;  %v365_v54 = vld [vmem:[%s3471_s18 + $0x300] sm:$0xff]  ;;  %v367_v55 = vld [vmem:[%s3471_s18 + $0x308] sm:$0xff]  ;;  %v369_v56 = vld [vmem:[%s3471_s18 + $0x310] sm:$0xff] }
  0x2c   : > { %302 = vst [vmem:[%s3476_s19 + $0x80] sm:$0xff] %v301_v22  ;;  %v371_v57 = vld [vmem:[%s3471_s18 + $0x330] sm:$0xff]  ;;  %v373_v58 = vld [vmem:[%s3471_s18 + $0x338] sm:$0xff]  ;;  %v375_v59 = vld [vmem:[%s3471_s18 + $0x340] sm:$0xff] }
  0x2d   : > { %304 = vst [vmem:[%s3476_s19 + $0x88] sm:$0xff] %v303_v23  ;;  %v377_v60 = vld [vmem:[%s3471_s18 + $0x360] sm:$0xff]  ;;  %v379_v61 = vld [vmem:[%s3471_s18 + $0x368] sm:$0xff]  ;;  %v381_v62 = vld [vmem:[%s3471_s18 + $0x370] sm:$0xff] }
  0x2e   : > { %306 = vst [vmem:[%s3476_s19 + $0x90] sm:$0xff] %v305_v24  ;;  %v383_v63 = vld [vmem:[%s3471_s18 + $0x390] sm:$0xff]  ;;  %v385_v0 = vld [vmem:[%s3471_s18 + $0x398] sm:$0xff]  ;;  %v387_v1 = vld [vmem:[%s3471_s18 + $0x3a0] sm:$0xff] }
  0x2f   : > { %308 = vst [vmem:[%s3476_s19 + $0x98] sm:$0xff] %v307_v25  ;;  %v389_v2 = vld [vmem:[%s3471_s18 + $0x3c0] sm:$0xff]  ;;  %v391_v3 = vld [vmem:[%s3471_s18 + $0x3c8] sm:$0xff]  ;;  %v393_v4 = vld [vmem:[%s3471_s18 + $0x3d0] sm:$0xff] }
  0x30   : > { %310 = vst [vmem:[%s3476_s19 + $0xa0] sm:$0xff] %v309_v26  ;;  %v395_v5 = vld [vmem:[%s3471_s18 + $0x3f0] sm:$0xff]  ;;  %v397_v6 = vld [vmem:[%s3471_s18 + $0x3f8] sm:$0xff]  ;;  %v399_v7 = vld [vmem:[%s3471_s18 + $0x400] sm:$0xff] }
  0x31   : > { %312 = vst [vmem:[%s3476_s19 + $0xa8] sm:$0xff] %v311_v27  ;;  %v401_v8 = vld [vmem:[%s3471_s18 + $0x420] sm:$0xff]  ;;  %v403_v9 = vld [vmem:[%s3471_s18 + $0x428] sm:$0xff]  ;;  %v405_v10 = vld [vmem:[%s3471_s18 + $0x430] sm:$0xff] }
  0x32   : > { %314 = vst [vmem:[%s3476_s19 + $0xb0] sm:$0xff] %v313_v28  ;;  %v407_v11 = vld [vmem:[%s3471_s18 + $0x450] sm:$0xff]  ;;  %v409_v12 = vld [vmem:[%s3471_s18 + $0x458] sm:$0xff]  ;;  %v411_v13 = vld [vmem:[%s3471_s18 + $0x460] sm:$0xff] }
  0x33   : > { %316 = vst [vmem:[%s3476_s19 + $0xb8] sm:$0xff] %v315_v29  ;;  %v413_v14 = vld [vmem:[%s3471_s18 + $0x480] sm:$0xff]  ;;  %v415_v15 = vld [vmem:[%s3471_s18 + $0x488] sm:$0xff]  ;;  %v417_v16 = vld [vmem:[%s3471_s18 + $0x490] sm:$0xff] }
  0x34   : > { %318 = vst [vmem:[%s3476_s19 + $0xc0] sm:$0xff] %v317_v30  ;;  %v419_v17 = vld [vmem:[%s3471_s18 + $0x4b0] sm:$0xff]  ;;  %v421_v18 = vld [vmem:[%s3471_s18 + $0x4b8] sm:$0xff]  ;;  %v423_v19 = vld [vmem:[%s3471_s18 + $0x4c0] sm:$0xff] }
  0x35   : > { %320 = vst [vmem:[%s3476_s19 + $0xc8] sm:$0xff] %v319_v31  ;;  %v425_v20 = vld [vmem:[%s3471_s18 + $0x4e0] sm:$0xff]  ;;  %v427_v21 = vld [vmem:[%s3471_s18 + $0x4e8] sm:$0xff]  ;;  %v429_v22 = vld [vmem:[%s3471_s18 + $0x4f0] sm:$0xff] }
  0x36   : > { %322 = vst [vmem:[%s3476_s19 + $0xd0] sm:$0xff] %v321_v32  ;;  %v431_v23 = vld [vmem:[%s3471_s18 + $0x510] sm:$0xff]  ;;  %v433_v24 = vld [vmem:[%s3471_s18 + $0x518] sm:$0xff]  ;;  %v435_v25 = vld [vmem:[%s3471_s18 + $0x520] sm:$0xff] }
  0x37   : > { %324 = vst [vmem:[%s3476_s19 + $0xd8] sm:$0xff] %v323_v33  ;;  %v437_v26 = vld [vmem:[%s3471_s18 + $0x540] sm:$0xff]  ;;  %v439_v27 = vld [vmem:[%s3471_s18 + $0x548] sm:$0xff]  ;;  %v441_v28 = vld [vmem:[%s3471_s18 + $0x550] sm:$0xff] }
  0x38   : > { %326 = vst [vmem:[%s3476_s19 + $0xe0] sm:$0xff] %v325_v34  ;;  %v443_v29 = vld [vmem:[%s3471_s18 + $0x570] sm:$0xff]  ;;  %v445_v30 = vld [vmem:[%s3471_s18 + $0x578] sm:$0xff]  ;;  %v447_v31 = vld [vmem:[%s3471_s18 + $0x580] sm:$0xff] }
  0x39   : > { %328 = vst [vmem:[%s3476_s19 + $0xe8] sm:$0xff] %v327_v35  ;;  %v449_v32 = vld [vmem:[%s3471_s18 + $0x5a0] sm:$0xff]  ;;  %v451_v33 = vld [vmem:[%s3471_s18 + $0x5a8] sm:$0xff]  ;;  %v453_v34 = vld [vmem:[%s3471_s18 + $0x5b0] sm:$0xff] }
  0x3a   : > { %330 = vst [vmem:[%s3476_s19 + $0xf0] sm:$0xff] %v329_v36  ;;  %v455_v35 = vld [vmem:[%s3471_s18 + $0x5d0] sm:$0xff]  ;;  %v457_v36 = vld [vmem:[%s3471_s18 + $0x5d8] sm:$0xff] }
  0x3b   : > { %332 = vst [vmem:[%s3476_s19 + $0xf8] sm:$0xff] %v331_v37  ;;  %v459_v37 = vld [vmem:[%s3471_s18 + $0x5e0] sm:$0xff] }
  0x3c   : > { %334 = vst [vmem:[%s3476_s19 + $0x100] sm:$0xff] %v333_v38  ;;  %v461_v38 = vld [vmem:[%s3471_s18 + $0x600] sm:$0xff] }
  0x3d   : > { %336 = vst [vmem:[%s3476_s19 + $0x108] sm:$0xff] %v335_v39  ;;  %v463_v39 = vld [vmem:[%s3471_s18 + $0x608] sm:$0xff] }
  0x3e   : > { %338 = vst [vmem:[%s3476_s19 + $0x110] sm:$0xff] %v337_v40  ;;  %v465_v40 = vld [vmem:[%s3471_s18 + $0x610] sm:$0xff] }
  0x3f   : > { %340 = vst [vmem:[%s3476_s19 + $0x118] sm:$0xff] %v339_v41  ;;  %v467_v41 = vld [vmem:[%s3471_s18 + $0x630] sm:$0xff] }
  0x40   : > { %342 = vst [vmem:[%s3476_s19 + $0x120] sm:$0xff] %v341_v42  ;;  %v469_v42 = vld [vmem:[%s3471_s18 + $0x638] sm:$0xff] }
  0x41   : > { %344 = vst [vmem:[%s3476_s19 + $0x128] sm:$0xff] %v343_v43  ;;  %v471_v43 = vld [vmem:[%s3471_s18 + $0x640] sm:$0xff] }
  0x42   : > { %346 = vst [vmem:[%s3476_s19 + $0x130] sm:$0xff] %v345_v44  ;;  %v473_v44 = vld [vmem:[%s3471_s18 + $0x660] sm:$0xff] }
  0x43   : > { %348 = vst [vmem:[%s3476_s19 + $0x138] sm:$0xff] %v347_v45  ;;  %v475_v45 = vld [vmem:[%s3471_s18 + $0x668] sm:$0xff] }
  0x44   : > { %350 = vst [vmem:[%s3476_s19 + $0x140] sm:$0xff] %v349_v46  ;;  %v477_v46 = vld [vmem:[%s3471_s18 + $0x670] sm:$0xff] }
  0x45   : > { %352 = vst [vmem:[%s3476_s19 + $0x148] sm:$0xff] %v351_v47  ;;  %v479_v47 = vld [vmem:[%s3471_s18 + $0x690] sm:$0xff] }
  0x46   : > { %354 = vst [vmem:[%s3476_s19 + $0x150] sm:$0xff] %v353_v48  ;;  %v481_v48 = vld [vmem:[%s3471_s18 + $0x698] sm:$0xff] }
  0x47   : > { %356 = vst [vmem:[%s3476_s19 + $0x158] sm:$0xff] %v355_v49  ;;  %v483_v49 = vld [vmem:[%s3471_s18 + $0x6a0] sm:$0xff] }
  0x48   : > { %358 = vst [vmem:[%s3476_s19 + $0x160] sm:$0xff] %v357_v50  ;;  %v485_v50 = vld [vmem:[%s3471_s18 + $0x6c0] sm:$0xff] }
  0x49   : > { %360 = vst [vmem:[%s3476_s19 + $0x168] sm:$0xff] %v359_v51  ;;  %v487_v51 = vld [vmem:[%s3471_s18 + $0x6c8] sm:$0xff] }
  0x4a   : > { %362 = vst [vmem:[%s3476_s19 + $0x170] sm:$0xff] %v361_v52  ;;  %v489_v52 = vld [vmem:[%s3471_s18 + $0x6d0] sm:$0xff] }
  0x4b   : > { %364 = vst [vmem:[%s3476_s19 + $0x178] sm:$0xff] %v363_v53  ;;  %v491_v53 = vld [vmem:[%s3471_s18 + $0x6f0] sm:$0xff] }
  0x4c   : > { %366 = vst [vmem:[%s3476_s19 + $0x180] sm:$0xff] %v365_v54  ;;  %v493_v54 = vld [vmem:[%s3471_s18 + $0x6f8] sm:$0xff] }
  0x4d   : > { %368 = vst [vmem:[%s3476_s19 + $0x188] sm:$0xff] %v367_v55  ;;  %v495_v55 = vld [vmem:[%s3471_s18 + $0x700] sm:$0xff] }
  0x4e   : > { %370 = vst [vmem:[%s3476_s19 + $0x190] sm:$0xff] %v369_v56  ;;  %v497_v56 = vld [vmem:[%s3471_s18 + $0x720] sm:$0xff] }
  0x4f   : > { %372 = vst [vmem:[%s3476_s19 + $0x198] sm:$0xff] %v371_v57  ;;  %v499_v57 = vld [vmem:[%s3471_s18 + $0x728] sm:$0xff] }
  0x50   : > { %374 = vst [vmem:[%s3476_s19 + $0x1a0] sm:$0xff] %v373_v58  ;;  %v501_v58 = vld [vmem:[%s3471_s18 + $0x730] sm:$0xff] }
  0x51   : > { %376 = vst [vmem:[%s3476_s19 + $0x1a8] sm:$0xff] %v375_v59  ;;  %v503_v59 = vld [vmem:[%s3471_s18 + $0x750] sm:$0xff] }
  0x52   : > { %378 = vst [vmem:[%s3476_s19 + $0x1b0] sm:$0xff] %v377_v60  ;;  %v505_v60 = vld [vmem:[%s3471_s18 + $0x758] sm:$0xff] }
  0x53   : > { %380 = vst [vmem:[%s3476_s19 + $0x1b8] sm:$0xff] %v379_v61  ;;  %v507_v61 = vld [vmem:[%s3471_s18 + $0x760] sm:$0xff] }
  0x54   : > { %382 = vst [vmem:[%s3476_s19 + $0x1c0] sm:$0xff] %v381_v62  ;;  %v509_v62 = vld [vmem:[%s3471_s18 + $0x780] sm:$0xff] }
  0x55   : > { %384 = vst [vmem:[%s3476_s19 + $0x1c8] sm:$0xff] %v383_v63  ;;  %v511_v63 = vld [vmem:[%s3471_s18 + $0x788] sm:$0xff] }
  0x56   : > { %386 = vst [vmem:[%s3476_s19 + $0x1d0] sm:$0xff] %v385_v0  ;;  %v513_v0 = vld [vmem:[%s3471_s18 + $0x790] sm:$0xff] }
  0x57   : > { %388 = vst [vmem:[%s3476_s19 + $0x1d8] sm:$0xff] %v387_v1  ;;  %v515_v1 = vld [vmem:[%s3471_s18 + $0x7b0] sm:$0xff] }
  0x58   : > { %390 = vst [vmem:[%s3476_s19 + $0x1e0] sm:$0xff] %v389_v2  ;;  %v517_v2 = vld [vmem:[%s3471_s18 + $0x7b8] sm:$0xff] }
  0x59   : > { %392 = vst [vmem:[%s3476_s19 + $0x1e8] sm:$0xff] %v391_v3  ;;  %v519_v3 = vld [vmem:[%s3471_s18 + $0x7c0] sm:$0xff] }
  0x5a   : > { %394 = vst [vmem:[%s3476_s19 + $0x1f0] sm:$0xff] %v393_v4  ;;  %v521_v4 = vld [vmem:[%s3471_s18 + $0x7e0] sm:$0xff] }
  0x5b   : > { %396 = vst [vmem:[%s3476_s19 + $0x1f8] sm:$0xff] %v395_v5  ;;  %v523_v5 = vld [vmem:[%s3471_s18 + $0x7e8] sm:$0xff] }
  0x5c   : > { %398 = vst [vmem:[%s3476_s19 + $0x200] sm:$0xff] %v397_v6  ;;  %v525_v6 = vld [vmem:[%s3471_s18 + $0x7f0] sm:$0xff] }
  0x5d   : > { %400 = vst [vmem:[%s3476_s19 + $0x208] sm:$0xff] %v399_v7  ;;  %v527_v7 = vld [vmem:[%s3471_s18 + $0x810] sm:$0xff] }
  0x5e   : > { %402 = vst [vmem:[%s3476_s19 + $0x210] sm:$0xff] %v401_v8  ;;  %v529_v8 = vld [vmem:[%s3471_s18 + $0x818] sm:$0xff] }
  0x5f   : > { %404 = vst [vmem:[%s3476_s19 + $0x218] sm:$0xff] %v403_v9  ;;  %v531_v9 = vld [vmem:[%s3471_s18 + $0x820] sm:$0xff] }
  0x60   : > { %406 = vst [vmem:[%s3476_s19 + $0x220] sm:$0xff] %v405_v10  ;;  %v533_v10 = vld [vmem:[%s3471_s18 + $0x840] sm:$0xff] }
  0x61   : > { %408 = vst [vmem:[%s3476_s19 + $0x228] sm:$0xff] %v407_v11  ;;  %v535_v11 = vld [vmem:[%s3471_s18 + $0x848] sm:$0xff] }
  0x62   : > { %410 = vst [vmem:[%s3476_s19 + $0x230] sm:$0xff] %v409_v12  ;;  %v537_v12 = vld [vmem:[%s3471_s18 + $0x850] sm:$0xff] }
  0x63   : > { %412 = vst [vmem:[%s3476_s19 + $0x238] sm:$0xff] %v411_v13  ;;  %v539_v13 = vld [vmem:[%s3471_s18 + $0x870] sm:$0xff] }
  0x64   : > { %414 = vst [vmem:[%s3476_s19 + $0x240] sm:$0xff] %v413_v14  ;;  %v541_v14 = vld [vmem:[%s3471_s18 + $0x878] sm:$0xff] }
  0x65   : > { %416 = vst [vmem:[%s3476_s19 + $0x248] sm:$0xff] %v415_v15  ;;  %v543_v15 = vld [vmem:[%s3471_s18 + $0x880] sm:$0xff] }
  0x66   : > { %418 = vst [vmem:[%s3476_s19 + $0x250] sm:$0xff] %v417_v16  ;;  %v545_v16 = vld [vmem:[%s3471_s18 + $0x8a0] sm:$0xff] }
  0x67   : > { %420 = vst [vmem:[%s3476_s19 + $0x258] sm:$0xff] %v419_v17  ;;  %v547_v17 = vld [vmem:[%s3471_s18 + $0x8a8] sm:$0xff] }
  0x68   : > { %422 = vst [vmem:[%s3476_s19 + $0x260] sm:$0xff] %v421_v18  ;;  %v549_v18 = vld [vmem:[%s3471_s18 + $0x8b0] sm:$0xff] }
  0x69   : > { %424 = vst [vmem:[%s3476_s19 + $0x268] sm:$0xff] %v423_v19  ;;  %v551_v19 = vld [vmem:[%s3471_s18 + $0x8d0] sm:$0xff] }
  0x6a   : > { %426 = vst [vmem:[%s3476_s19 + $0x270] sm:$0xff] %v425_v20  ;;  %v553_v20 = vld [vmem:[%s3471_s18 + $0x8d8] sm:$0xff] }
  0x6b   : > { %428 = vst [vmem:[%s3476_s19 + $0x278] sm:$0xff] %v427_v21  ;;  %v555_v21 = vld [vmem:[%s3471_s18 + $0x8e0] sm:$0xff] }
  0x6c   : > { %430 = vst [vmem:[%s3476_s19 + $0x280] sm:$0xff] %v429_v22  ;;  %v557_v22 = vld [vmem:[%s3471_s18 + $0x900] sm:$0xff] }
  0x6d   : > { %432 = vst [vmem:[%s3476_s19 + $0x288] sm:$0xff] %v431_v23  ;;  %v559_v23 = vld [vmem:[%s3471_s18 + $0x908] sm:$0xff] }
  0x6e   : > { %434 = vst [vmem:[%s3476_s19 + $0x290] sm:$0xff] %v433_v24  ;;  %v561_v24 = vld [vmem:[%s3471_s18 + $0x910] sm:$0xff] }
  0x6f   : > { %436 = vst [vmem:[%s3476_s19 + $0x298] sm:$0xff] %v435_v25  ;;  %v563_v25 = vld [vmem:[%s3471_s18 + $0x930] sm:$0xff] }
  0x70   : > { %438 = vst [vmem:[%s3476_s19 + $0x2a0] sm:$0xff] %v437_v26  ;;  %v565_v26 = vld [vmem:[%s3471_s18 + $0x938] sm:$0xff] }
  0x71   : > { %440 = vst [vmem:[%s3476_s19 + $0x2a8] sm:$0xff] %v439_v27  ;;  %v567_v27 = vld [vmem:[%s3471_s18 + $0x940] sm:$0xff] }
  0x72   : > { %442 = vst [vmem:[%s3476_s19 + $0x2b0] sm:$0xff] %v441_v28  ;;  %v569_v28 = vld [vmem:[%s3471_s18 + $0x960] sm:$0xff] }
  0x73   : > { %444 = vst [vmem:[%s3476_s19 + $0x2b8] sm:$0xff] %v443_v29  ;;  %v571_v29 = vld [vmem:[%s3471_s18 + $0x968] sm:$0xff] }
  0x74   : > { %446 = vst [vmem:[%s3476_s19 + $0x2c0] sm:$0xff] %v445_v30  ;;  %v573_v30 = vld [vmem:[%s3471_s18 + $0x970] sm:$0xff] }
  0x75   : > { %448 = vst [vmem:[%s3476_s19 + $0x2c8] sm:$0xff] %v447_v31  ;;  %v575_v31 = vld [vmem:[%s3471_s18 + $0x990] sm:$0xff] }
  0x76   : > { %450 = vst [vmem:[%s3476_s19 + $0x2d0] sm:$0xff] %v449_v32  ;;  %v577_v32 = vld [vmem:[%s3471_s18 + $0x998] sm:$0xff] }
  0x77   : > { %452 = vst [vmem:[%s3476_s19 + $0x2d8] sm:$0xff] %v451_v33  ;;  %v579_v33 = vld [vmem:[%s3471_s18 + $0x9a0] sm:$0xff] }
  0x78   : > { %454 = vst [vmem:[%s3476_s19 + $0x2e0] sm:$0xff] %v453_v34  ;;  %v581_v34 = vld [vmem:[%s3471_s18 + $0x9c0] sm:$0xff] }
  0x79   : > { %456 = vst [vmem:[%s3476_s19 + $0x2e8] sm:$0xff] %v455_v35  ;;  %v583_v35 = vld [vmem:[%s3471_s18 + $0x9c8] sm:$0xff] }
  0x7a   : > { %458 = vst [vmem:[%s3476_s19 + $0x2f0] sm:$0xff] %v457_v36  ;;  %v585_v36 = vld [vmem:[%s3471_s18 + $0x9d0] sm:$0xff] }
  0x7b   : > { %460 = vst [vmem:[%s3476_s19 + $0x2f8] sm:$0xff] %v459_v37  ;;  %v587_v37 = vld [vmem:[%s3471_s18 + $0x9f0] sm:$0xff] }
  0x7c   : > { %462 = vst [vmem:[%s3476_s19 + $0x300] sm:$0xff] %v461_v38  ;;  %v589_v38 = vld [vmem:[%s3471_s18 + $0x9f8] sm:$0xff] }
  0x7d   : > { %464 = vst [vmem:[%s3476_s19 + $0x308] sm:$0xff] %v463_v39  ;;  %v591_v39 = vld [vmem:[%s3471_s18 + $0xa00] sm:$0xff] }
  0x7e   : > { %466 = vst [vmem:[%s3476_s19 + $0x310] sm:$0xff] %v465_v40  ;;  %v593_v40 = vld [vmem:[%s3471_s18 + $0xa20] sm:$0xff] }
  0x7f   : > { %468 = vst [vmem:[%s3476_s19 + $0x318] sm:$0xff] %v467_v41  ;;  %v595_v41 = vld [vmem:[%s3471_s18 + $0xa28] sm:$0xff] }
  0x80   : > { %470 = vst [vmem:[%s3476_s19 + $0x320] sm:$0xff] %v469_v42  ;;  %v597_v42 = vld [vmem:[%s3471_s18 + $0xa30] sm:$0xff] }
  0x81   : > { %472 = vst [vmem:[%s3476_s19 + $0x328] sm:$0xff] %v471_v43  ;;  %v599_v43 = vld [vmem:[%s3471_s18 + $0xa50] sm:$0xff] }
  0x82   : > { %474 = vst [vmem:[%s3476_s19 + $0x330] sm:$0xff] %v473_v44  ;;  %v601_v44 = vld [vmem:[%s3471_s18 + $0xa58] sm:$0xff] }
  0x83   : > { %476 = vst [vmem:[%s3476_s19 + $0x338] sm:$0xff] %v475_v45  ;;  %v603_v45 = vld [vmem:[%s3471_s18 + $0xa60] sm:$0xff] }
  0x84   : > { %478 = vst [vmem:[%s3476_s19 + $0x340] sm:$0xff] %v477_v46  ;;  %v605_v46 = vld [vmem:[%s3471_s18 + $0xa80] sm:$0xff] }
  0x85   : > { %480 = vst [vmem:[%s3476_s19 + $0x348] sm:$0xff] %v479_v47  ;;  %v607_v47 = vld [vmem:[%s3471_s18 + $0xa88] sm:$0xff] }
  0x86   : > { %482 = vst [vmem:[%s3476_s19 + $0x350] sm:$0xff] %v481_v48  ;;  %v609_v48 = vld [vmem:[%s3471_s18 + $0xa90] sm:$0xff] }
  0x87   : > { %484 = vst [vmem:[%s3476_s19 + $0x358] sm:$0xff] %v483_v49  ;;  %v611_v49 = vld [vmem:[%s3471_s18 + $0xab0] sm:$0xff] }
  0x88   : > { %486 = vst [vmem:[%s3476_s19 + $0x360] sm:$0xff] %v485_v50  ;;  %v613_v50 = vld [vmem:[%s3471_s18 + $0xab8] sm:$0xff] }
  0x89   : > { %488 = vst [vmem:[%s3476_s19 + $0x368] sm:$0xff] %v487_v51  ;;  %v615_v51 = vld [vmem:[%s3471_s18 + $0xac0] sm:$0xff] }
  0x8a   : > { %490 = vst [vmem:[%s3476_s19 + $0x370] sm:$0xff] %v489_v52 }
  0x8b   : > { %492 = vst [vmem:[%s3476_s19 + $0x378] sm:$0xff] %v491_v53 }
  0x8c   : > { %494 = vst [vmem:[%s3476_s19 + $0x380] sm:$0xff] %v493_v54 }
  0x8d   : > { %496 = vst [vmem:[%s3476_s19 + $0x388] sm:$0xff] %v495_v55 }
  0x8e   : > { %498 = vst [vmem:[%s3476_s19 + $0x390] sm:$0xff] %v497_v56 }
  0x8f   : > { %500 = vst [vmem:[%s3476_s19 + $0x398] sm:$0xff] %v499_v57 }
  0x90   : > { %502 = vst [vmem:[%s3476_s19 + $0x3a0] sm:$0xff] %v501_v58 }
  0x91   : > { %504 = vst [vmem:[%s3476_s19 + $0x3a8] sm:$0xff] %v503_v59 }
  0x92   : > { %506 = vst [vmem:[%s3476_s19 + $0x3b0] sm:$0xff] %v505_v60 }
  0x93   : > { %508 = vst [vmem:[%s3476_s19 + $0x3b8] sm:$0xff] %v507_v61 }
  0x94   : > { %510 = vst [vmem:[%s3476_s19 + $0x3c0] sm:$0xff] %v509_v62 }
  0x95   : > { %512 = vst [vmem:[%s3476_s19 + $0x3c8] sm:$0xff] %v511_v63 }
  0x96   : > { %514 = vst [vmem:[%s3476_s19 + $0x3d0] sm:$0xff] %v513_v0 }
  0x97   : > { %516 = vst [vmem:[%s3476_s19 + $0x3d8] sm:$0xff] %v515_v1 }
  0x98   : > { %518 = vst [vmem:[%s3476_s19 + $0x3e0] sm:$0xff] %v517_v2 }
  0x99   : > { %520 = vst [vmem:[%s3476_s19 + $0x3e8] sm:$0xff] %v519_v3 }
  0x9a   : > { %522 = vst [vmem:[%s3476_s19 + $0x3f0] sm:$0xff] %v521_v4 }
  0x9b   : > { %524 = vst [vmem:[%s3476_s19 + $0x3f8] sm:$0xff] %v523_v5 }
  0x9c   : > { %526 = vst [vmem:[%s3476_s19 + $0x400] sm:$0xff] %v525_v6 }
  0x9d   : > { %528 = vst [vmem:[%s3476_s19 + $0x408] sm:$0xff] %v527_v7 }
  0x9e   : > { %530 = vst [vmem:[%s3476_s19 + $0x410] sm:$0xff] %v529_v8 }
  0x9f   : > { %532 = vst [vmem:[%s3476_s19 + $0x418] sm:$0xff] %v531_v9 }
  0xa0   : > { %534 = vst [vmem:[%s3476_s19 + $0x420] sm:$0xff] %v533_v10 }
  0xa1   : > { %536 = vst [vmem:[%s3476_s19 + $0x428] sm:$0xff] %v535_v11 }
  0xa2   : > { %538 = vst [vmem:[%s3476_s19 + $0x430] sm:$0xff] %v537_v12 }
  0xa3   : > { %540 = vst [vmem:[%s3476_s19 + $0x438] sm:$0xff] %v539_v13 }
  0xa4   : > { %542 = vst [vmem:[%s3476_s19 + $0x440] sm:$0xff] %v541_v14 }
  0xa5   : > { %544 = vst [vmem:[%s3476_s19 + $0x448] sm:$0xff] %v543_v15 }
  0xa6   : > { %546 = vst [vmem:[%s3476_s19 + $0x450] sm:$0xff] %v545_v16 }
  0xa7   : > { %548 = vst [vmem:[%s3476_s19 + $0x458] sm:$0xff] %v547_v17 }
  0xa8   : > { %550 = vst [vmem:[%s3476_s19 + $0x460] sm:$0xff] %v549_v18 }
  0xa9   : > { %552 = vst [vmem:[%s3476_s19 + $0x468] sm:$0xff] %v551_v19 }
  0xaa   : > { %554 = vst [vmem:[%s3476_s19 + $0x470] sm:$0xff] %v553_v20 }
  0xab   : > { %556 = vst [vmem:[%s3476_s19 + $0x478] sm:$0xff] %v555_v21 }
  0xac   : > { %558 = vst [vmem:[%s3476_s19 + $0x480] sm:$0xff] %v557_v22 }
  0xad   : > { %560 = vst [vmem:[%s3476_s19 + $0x488] sm:$0xff] %v559_v23 }
  0xae   : > { %562 = vst [vmem:[%s3476_s19 + $0x490] sm:$0xff] %v561_v24 }
  0xaf   : > { %564 = vst [vmem:[%s3476_s19 + $0x498] sm:$0xff] %v563_v25 }
  0xb0   : > { %566 = vst [vmem:[%s3476_s19 + $0x4a0] sm:$0xff] %v565_v26 }
  0xb1   : > { %568 = vst [vmem:[%s3476_s19 + $0x4a8] sm:$0xff] %v567_v27 }
  0xb2   : > { %570 = vst [vmem:[%s3476_s19 + $0x4b0] sm:$0xff] %v569_v28 }
  0xb3   : > { %572 = vst [vmem:[%s3476_s19 + $0x4b8] sm:$0xff] %v571_v29 }
  0xb4   : > { %574 = vst [vmem:[%s3476_s19 + $0x4c0] sm:$0xff] %v573_v30 }
  0xb5   : > { %576 = vst [vmem:[%s3476_s19 + $0x4c8] sm:$0xff] %v575_v31 }
  0xb6   : > { %578 = vst [vmem:[%s3476_s19 + $0x4d0] sm:$0xff] %v577_v32 }
  0xb7   : > { %580 = vst [vmem:[%s3476_s19 + $0x4d8] sm:$0xff] %v579_v33 }
  0xb8   : > { %582 = vst [vmem:[%s3476_s19 + $0x4e0] sm:$0xff] %v581_v34 }
  0xb9   : > { %584 = vst [vmem:[%s3476_s19 + $0x4e8] sm:$0xff] %v583_v35 }
  0xba   : > { %586 = vst [vmem:[%s3476_s19 + $0x4f0] sm:$0xff] %v585_v36 }
  0xbb   : > { %588 = vst [vmem:[%s3476_s19 + $0x4f8] sm:$0xff] %v587_v37 }
  0xbc   : > { %590 = vst [vmem:[%s3476_s19 + $0x500] sm:$0xff] %v589_v38 }
  0xbd   : > { %592 = vst [vmem:[%s3476_s19 + $0x508] sm:$0xff] %v591_v39 }
  0xbe   : > { %594 = vst [vmem:[%s3476_s19 + $0x510] sm:$0xff] %v593_v40 }
  0xbf   : > { %596 = vst [vmem:[%s3476_s19 + $0x518] sm:$0xff] %v595_v41 }
  0xc0   : > { %598 = vst [vmem:[%s3476_s19 + $0x520] sm:$0xff] %v597_v42 }
  0xc1   : > { %600 = vst [vmem:[%s3476_s19 + $0x528] sm:$0xff] %v599_v43 }
  0xc2   : > { %602 = vst [vmem:[%s3476_s19 + $0x530] sm:$0xff] %v601_v44 }
  0xc3   : > { %604 = vst [vmem:[%s3476_s19 + $0x538] sm:$0xff] %v603_v45 }
  0xc4   : > { %606 = vst [vmem:[%s3476_s19 + $0x540] sm:$0xff] %v605_v46 }
  0xc5   : > { %608 = vst [vmem:[%s3476_s19 + $0x548] sm:$0xff] %v607_v47 }
  0xc6   : > { %610 = vst [vmem:[%s3476_s19 + $0x550] sm:$0xff] %v609_v48 }
  0xc7   : > { %612 = vst [vmem:[%s3476_s19 + $0x558] sm:$0xff] %v611_v49 }
  0xc8   : > { %614 = vst [vmem:[%s3476_s19 + $0x560] sm:$0xff] %v613_v50 }
  0xc9   : > { %616 = vst [vmem:[%s3476_s19 + $0x568] sm:$0xff] %v615_v51 }
  0xca PF: > { %p2416_p5 = scmp.ge.s32.totalorder %s3386_s23, 1  ;;  %p629_p6 = scmp.lt.s32.totalorder %s3386_s23, 3 }
  0xcc   : > { %p630_p7 = pnand %p2416_p5, %p629_p6 }
  0xcd   : > { %s636_s20 = sand.u32 (!%p630_p7), 1, %s3378_s21   ;;  %s687_s10 = smul.u32 (!%p630_p7), 6, %s2410_s24 }
  0xce   : > { %633 = sbr.rel (%p630_p7) target bundleno = 558 (0x22e), region = 78 }
  0xcf   : > { %s3338_s26 = smul.u32 (!%p630_p7), 1392, %s636_s20  ;;  %p688_p8 = scmp.lt.s32.totalorder (!%p630_p7), %s687_s10, 11 }
  0xd0   : > { %s4186_s7 = smul.u32 (!%p630_p7), 48, %s636_s20 }
  0xd1   : > { %s3831_s27 = scalar_lea.vmem (!%p630_p7), [#allocation3], %s3338_s26 }
  0xd2   : > { %s4210_s21 = scalar_lea.vmem (!%p630_p7), [#allocation2], %s4186_s7 }
  0xd3   : > { %vm1770_vm0 = vcmask 1044480   ;;  %vm1771_vm1 = vcmask 1045504   ;;  %v3388_v52 = vmov 65535   ;;  %v2589_v55 = vld [vmem:[%s3831_s27 + $0x150] sm:$0xf]  ;;  %vm1766_vm2 = vcmask 613376  }
  0xd4   : > { %v1772_v53 = vsel %vm1770_vm0, 4294967295, %v3388_v52  ;;  %v3206_v56 = vld [vmem:[%s3831_s27 + $0x164] sm:$0xf0]  ;;  %v2781_v57 = vld [vmem:[%s3831_s27 + $0x2d0] sm:$0xf]  ;;  %vm2142_vm3 = vcmask 80896  }
  0xd5   : > { %v3829_v54 = vsel %vm1771_vm1, %v1772_v53, 0  ;;  %v2590_v58 = vor.u32 %v3206_v56, %v2589_v55  ;;  %v3254_v59 = vld [vmem:[%s3831_s27 + $0x2e4] sm:$0xf0]  ;;  %v2973_v60 = vld [vmem:[%s3831_s27 + $0x450] sm:$0xf]  ;;  %s4311_s10 = smov (!%p688_p8, %s687_s10), 11 }
  0xd6   : > { %v3302_v61 = vld [vmem:[%s3831_s27 + $0x464] sm:$0xf0]  ;;  %v2782_v62 = vor.u32 %v3254_v59, %v2781_v57  ;;  %v3093_v0 = vld [vmem:[%s3831_s27 + $0x540] sm:$0xf]  ;;  %v3332_v1 = vld [vmem:[%s3831_s27 + $0x554] sm:$0x30]  ;;  %s690_s13 = scalar_lea.vmem %s4303_s4, %s4311_s10 }
  0xd7   : > { %v2974_v63 = vor.u32 %v3302_v61, %v2973_v60  ;;  %v2565_v2 = vld [vmem:[%s3831_s27 + $0x120] sm:$0xf]  ;;  %1792 = vmatpush.bf16.msra.mxu0 %v2590_v58  ;;  %v3094_v3 = vor.u32 %v3332_v1, %v3093_v0  ;;  %v3200_v4 = vld [vmem:[%s3831_s27 + $0x134] sm:$0xf0]  ;;  %v3069_v11 = vld [vmem:[%s3831_s27 + $0x510] sm:$0xf] }
  0xd8   : > { %v2757_v5 = vld [vmem:[%s3831_s27 + $0x2a0] sm:$0xf]  ;;  %v3248_v6 = vld [vmem:[%s3831_s27 + $0x2b4] sm:$0xf0]  ;;  %1805 = vmatpush.bf16.msra.mxu1 %v2782_v62  ;;  %v2566_v7 = vor.u32 %v3200_v4, %v2565_v2  ;;  %v3326_v14 = vld [vmem:[%s3831_s27 + $0x524] sm:$0xf0] }
  0xd9   : > { %1818 = vmatpush.bf16.msra.mxu2 %v2974_v63  ;;  %v2758_v8 = vor.u32 %v3248_v6, %v2757_v5  ;;  %v2949_v9 = vld [vmem:[%s3831_s27 + $0x420] sm:$0xf]  ;;  %v3296_v10 = vld [vmem:[%s3831_s27 + $0x434] sm:$0xf0]  ;;  %v1775_v12 = vand.u32 %v3094_v3, %v3829_v54  ;;  %v2541_v15 = vld [vmem:[%s3831_s27 + $0xf0] sm:$0xf]  ;;  %v3070_v20 = vor.u32 %v3326_v14, %v3069_v11 }
  0xda   : > { %v2950_v13 = vor.u32 %v3296_v10, %v2949_v9  ;;  %v3194_v16 = vld [vmem:[%s3831_s27 + $0x104] sm:$0xf0]  ;;  %v2733_v17 = vld [vmem:[%s3831_s27 + $0x270] sm:$0xf]  ;;  %v3045_v23 = vld [vmem:[%s3831_s27 + $0x4e0] sm:$0xf] }
  0xdb   : > { %v3242_v18 = vld [vmem:[%s3831_s27 + $0x284] sm:$0xf0]  ;;  %v2925_v19 = vld [vmem:[%s3831_s27 + $0x3f0] sm:$0xf]  ;;  %1834 = vmatpush.bf16.msra.mxu3 %v1775_v12  ;;  %1793 = vmatpush.bf16.msra.mxu0 %v2566_v7  ;;  %v2542_v21 = vor.u32 %v3194_v16, %v2541_v15  ;;  %v3320_v24 = vld [vmem:[%s3831_s27 + $0x4f4] sm:$0xf0] }
  0xdc   : > { %v3290_v22 = vld [vmem:[%s3831_s27 + $0x404] sm:$0xf0]  ;;  %1806 = vmatpush.bf16.msra.mxu1 %v2758_v8  ;;  %v2734_v25 = vor.u32 %v3242_v18, %v2733_v17  ;;  %v2517_v27 = vld [vmem:[%s3831_s27 + $0xc0] sm:$0xf]  ;;  %v3188_v28 = vld [vmem:[%s3831_s27 + $0xd4] sm:$0xf0]  ;;  %v3046_v33 = vor.u32 %v3320_v24, %v3045_v23 }
  0xdd   : > { %1819 = vmatpush.bf16.msra.mxu2 %v2950_v13  ;;  %v2926_v26 = vor.u32 %v3290_v22, %v2925_v19  ;;  %v2709_v29 = vld [vmem:[%s3831_s27 + $0x240] sm:$0xf]  ;;  %v3236_v30 = vld [vmem:[%s3831_s27 + $0x254] sm:$0xf0]  ;;  %v2518_v34 = vor.u32 %v3188_v28, %v2517_v27  ;;  %v3021_v35 = vld [vmem:[%s3831_s27 + $0x4b0] sm:$0xf] }
  0xde   : > { %v2901_v31 = vld [vmem:[%s3831_s27 + $0x3c0] sm:$0xf]  ;;  %v3284_v32 = vld [vmem:[%s3831_s27 + $0x3d4] sm:$0xf0]  ;;  %v3314_v36 = vld [vmem:[%s3831_s27 + $0x4c4] sm:$0xf0]  ;;  %v2710_v37 = vor.u32 %v3236_v30, %v2709_v29 }
  0xdf   : > { %1835 = vmatpush.bf16.msra.mxu3 %v3070_v20  ;;  %1794 = vmatpush.bf16.msra.mxu0 %v2542_v21  ;;  %v2902_v38 = vor.u32 %v3284_v32, %v2901_v31  ;;  %v2493_v39 = vld [vmem:[%s3831_s27 + $0x90] sm:$0xf]  ;;  %v3182_v40 = vld [vmem:[%s3831_s27 + $0xa4] sm:$0xf0]  ;;  %v3022_v45 = vor.u32 %v3314_v36, %v3021_v35  ;;  %v2997_v47 = vld [vmem:[%s3831_s27 + $0x480] sm:$0xf] }
  0xe0   : > { %1807 = vmatpush.bf16.msra.mxu1 %v2734_v25  ;;  %v2685_v41 = vld [vmem:[%s3831_s27 + $0x210] sm:$0xf]  ;;  %v3230_v42 = vld [vmem:[%s3831_s27 + $0x224] sm:$0xf0]  ;;  %v2494_v46 = vor.u32 %v3182_v40, %v2493_v39  ;;  %v3308_v48 = vld [vmem:[%s3831_s27 + $0x494] sm:$0xf0] }
  0xe1   : > { %1820 = vmatpush.bf16.msra.mxu2 %v2926_v26  ;;  %v2877_v43 = vld [vmem:[%s3831_s27 + $0x390] sm:$0xf]  ;;  %v3278_v44 = vld [vmem:[%s3831_s27 + $0x3a4] sm:$0xf0]  ;;  %v2686_v49 = vor.u32 %v3230_v42, %v2685_v41  ;;  %v3203_v51 = vld [vmem:[%s3831_s27 + $0x154] sm:$0xf]  ;;  %v2998_v60 = vor.u32 %v3308_v48, %v2997_v47 }
  0xe2   : > { %v2878_v50 = vor.u32 %v3278_v44, %v2877_v43  ;;  %v2469_v52 = vld [vmem:[%s3831_s27 + $0x60] sm:$0xf]  ;;  %v3176_v53 = vld [vmem:[%s3831_s27 + $0x74] sm:$0xf0]  ;;  %v2591_v55 = vld [vmem:[%s3831_s27 + $0x168] sm:$0xf0] }
  0xe3   : > { %1836 = vmatpush.bf16.msra.mxu3 %v3046_v33  ;;  %1795 = vmatpush.bf16.msra.mxu0 %v2518_v34  ;;  %v2661_v56 = vld [vmem:[%s3831_s27 + $0x1e0] sm:$0xf]  ;;  %v3224_v57 = vld [vmem:[%s3831_s27 + $0x1f4] sm:$0xf0]  ;;  %v2470_v61 = vor.u32 %v3176_v53, %v2469_v52  ;;  %v2594_v62 = vor.u32 %v3203_v51, %v2591_v55  ;;  %v3197_v0 = vld [vmem:[%s3831_s27 + $0x124] sm:$0xf] }
  0xe4   : > { %1808 = vmatpush.bf16.msra.mxu1 %v2710_v37  ;;  %v2853_v58 = vld [vmem:[%s3831_s27 + $0x360] sm:$0xf]  ;;  %v3272_v59 = vld [vmem:[%s3831_s27 + $0x374] sm:$0xf0]  ;;  %v2662_v63 = vor.u32 %v3224_v57, %v2661_v56  ;;  %v2445_v1 = vld [vmem:[%s3831_s27 + $0x30] sm:$0xf] }
  0xe5   : > { %1821 = vmatpush.bf16.msra.mxu2 %v2902_v38  ;;  %v3170_v2 = vld [vmem:[%s3831_s27 + $0x44] sm:$0xf0]  ;;  %v2854_v3 = vor.u32 %v3272_v59, %v2853_v58  ;;  %v2567_v4 = vld [vmem:[%s3831_s27 + $0x138] sm:$0xf0]  ;;  %v2637_v5 = vld [vmem:[%s3831_s27 + $0x1b0] sm:$0xf] }
  0xe6   : > { %v3218_v6 = vld [vmem:[%s3831_s27 + $0x1c4] sm:$0xf0]  ;;  %v2829_v7 = vld [vmem:[%s3831_s27 + $0x330] sm:$0xf]  ;;  %v2446_v9 = vor.u32 %v3170_v2, %v2445_v1  ;;  %v3191_v10 = vld [vmem:[%s3831_s27 + $0xf4] sm:$0xf]  ;;  %v2570_v13 = vor.u32 %v3197_v0, %v2567_v4 }
  0xe7   : > { %1837 = vmatpush.bf16.msra.mxu3 %v3022_v45  ;;  %1796 = vmatpush.bf16.msra.mxu0 %v2494_v46  ;;  %v3266_v8 = vld [vmem:[%s3831_s27 + $0x344] sm:$0xf0]  ;;  %v3329_v11 = vld [vmem:[%s3831_s27 + $0x544] sm:$0xf]  ;;  %v3095_v12 = vld [vmem:[%s3831_s27 + $0x558] sm:$0x30]  ;;  %v2638_v14 = vor.u32 %v3218_v6, %v2637_v5 }
  0xe8   : > { %1809 = vmatpush.bf16.msra.mxu1 %v2686_v49  ;;  %v2543_v15 = vld [vmem:[%s3831_s27 + $0x108] sm:$0xf0]  ;;  %v2421_v16 = vld [vmem:[%s3831_s27] sm:$0xf]  ;;  %v3164_v17 = vld [vmem:[%s3831_s27 + $0x14] sm:$0xf0]  ;;  %v2830_v18 = vor.u32 %v3266_v8, %v2829_v7  ;;  %v3098_v25 = vor.u32 %v3329_v11, %v3095_v12 }
  0xe9   : > { %1822 = vmatpush.bf16.msra.mxu2 %v2878_v50  ;;  %v2613_v19 = vld [vmem:[%s3831_s27 + $0x180] sm:$0xf]  ;;  %v3212_v20 = vld [vmem:[%s3831_s27 + $0x194] sm:$0xf0]  ;;  %v3251_v23 = vld [vmem:[%s3831_s27 + $0x2d4] sm:$0xf]  ;;  %v2422_v26 = vor.u32 %v3164_v17, %v2421_v16  ;;  %v2546_v29 = vor.u32 %v3191_v10, %v2543_v15 }
  0xea   : > { %v2805_v21 = vld [vmem:[%s3831_s27 + $0x300] sm:$0xf]  ;;  %v3260_v22 = vld [vmem:[%s3831_s27 + $0x314] sm:$0xf0]  ;;  %v2783_v24 = vld [vmem:[%s3831_s27 + $0x2e8] sm:$0xf0]  ;;  %v2614_v30 = vor.u32 %v3212_v20, %v2613_v19  ;;  %v1778_v38 = vand.u32 %v3098_v25, %v3829_v54 }
  0xeb   : > { %1838 = vmatpush.bf16.msra.mxu3 %v2998_v60  ;;  %1797 = vmatpush.bf16.msra.mxu0 %v2470_v61  ;;  %v3299_v27 = vld [vmem:[%s3831_s27 + $0x454] sm:$0xf]  ;;  %v2975_v28 = vld [vmem:[%s3831_s27 + $0x468] sm:$0xf0]  ;;  %v3185_v31 = vld [vmem:[%s3831_s27 + $0xc4] sm:$0xf]  ;;  %v2806_v32 = vor.u32 %v3260_v22, %v2805_v21  ;;  %v2786_v33 = vor.u32 %v3251_v23, %v2783_v24 }
  0xec   : > { %1810 = vmatpush.bf16.msra.mxu1 %v2662_v63  ;;  %v2519_v34 = vld [vmem:[%s3831_s27 + $0xd8] sm:$0xf0]  ;;  %v3245_v35 = vld [vmem:[%s3831_s27 + $0x2a4] sm:$0xf]  ;;  %v2978_v37 = vor.u32 %v3299_v27, %v2975_v28  ;;  %v3323_v42 = vld [vmem:[%s3831_s27 + $0x514] sm:$0xf] }
  0xed   : > { %1823 = vmatpush.bf16.msra.mxu2 %v2854_v3  ;;  %v713_v36 = vld [vmem:[%s4300_s1] sm:$0xff]  ;;  %v3293_v40 = vld [vmem:[%s3831_s27 + $0x424] sm:$0xf]  ;;  %v2522_v44 = vor.u32 %v3185_v31, %v2519_v34  ;;  %v3179_v45 = vld [vmem:[%s3831_s27 + $0x94] sm:$0xf]  ;;  %vm2252_vm4 = vcmask 1041408  }
  0xee   : > { %v2759_v39 = vld [vmem:[%s3831_s27 + $0x2b8] sm:$0xf0]  ;;  %715 = vst [vmem:[#allocation1] ss:$4 sm:$0xff] %v713_v36  ;;  %v3071_v43 = vld [vmem:[%s3831_s27 + $0x528] sm:$0xf0] }
  0xef   : > { %1844 = vmatpush.bf16.msrb.mxu3 %v2594_v62  ;;  %1798 = vmatpush.bf16.msra.mxu0 %v2446_v9  ;;  %v2951_v41 = vld [vmem:[%s3831_s27 + $0x438] sm:$0xf0]  ;;  %v2762_v46 = vor.u32 %v3245_v35, %v2759_v39  ;;  %v2495_v47 = vld [vmem:[%s3831_s27 + $0xa8] sm:$0xf0]  ;;  %v3239_v48 = vld [vmem:[%s3831_s27 + $0x274] sm:$0xf]  ;;  %v3074_v51 = vor.u32 %v3323_v42, %v3071_v43 }
  0xf0   : > { %1811 = vmatpush.bf16.msra.mxu1 %v2638_v14  ;;  %v2735_v49 = vld [vmem:[%s3831_s27 + $0x288] sm:$0xf0]  ;;  %v2954_v50 = vor.u32 %v3293_v40, %v2951_v41  ;;  %v3287_v52 = vld [vmem:[%s3831_s27 + $0x3f4] sm:$0xf]  ;;  %v3317_v55 = vld [vmem:[%s3831_s27 + $0x4e4] sm:$0xf]  ;;  %v2498_v59 = vor.u32 %v3179_v45, %v2495_v47 }
  0xf1   : > { %1824 = vmatpush.bf16.msra.mxu2 %v2830_v18  ;;  %v2927_v53 = vld [vmem:[%s3831_s27 + $0x408] sm:$0xf0]  ;;  %v3047_v56 = vld [vmem:[%s3831_s27 + $0x4f8] sm:$0xf0]  ;;  %v3173_v57 = vld [vmem:[%s3831_s27 + $0x64] sm:$0xf]  ;;  %v2738_v62 = vor.u32 %v3239_v48, %v2735_v49 }
  0xf2   : > { %v2471_v58 = vld [vmem:[%s3831_s27 + $0x78] sm:$0xf0]  ;;  %v3233_v60 = vld [vmem:[%s3831_s27 + $0x244] sm:$0xf]  ;;  %v2930_v63 = vor.u32 %v3287_v52, %v2927_v53  ;;  %v3050_v3 = vor.u32 %v3317_v55, %v3047_v56  ;;  %v3311_v7 = vld [vmem:[%s3831_s27 + $0x4b4] sm:$0xf] }
  0xf3   : > { %1845 = vmatpush.bf16.msrb.mxu3 %v2570_v13  ;;  %1799 = vmatpush.bf16.msra.mxu0 %v2422_v26  ;;  %v2711_v61 = vld [vmem:[%s3831_s27 + $0x258] sm:$0xf0]  ;;  %v3281_v2 = vld [vmem:[%s3831_s27 + $0x3c4] sm:$0xf]  ;;  %v3023_v8 = vld [vmem:[%s3831_s27 + $0x4c8] sm:$0xf0]  ;;  %v2474_v11 = vor.u32 %v3173_v57, %v2471_v58 }
  0xf4   : > { %1812 = vmatpush.bf16.msra.mxu1 %v2614_v30  ;;  %v2903_v6 = vld [vmem:[%s3831_s27 + $0x3d8] sm:$0xf0]  ;;  %v2714_v14 = vor.u32 %v3233_v60, %v2711_v61  ;;  %v3167_v15 = vld [vmem:[%s3831_s27 + $0x34] sm:$0xf]  ;;  %v2447_v16 = vld [vmem:[%s3831_s27 + $0x48] sm:$0xf0]  ;;  %v3026_v18 = vor.u32 %v3311_v7, %v3023_v8 }
  0xf5   : > { %1825 = vmatpush.bf16.msra.mxu2 %v2806_v32  ;;  %v718_v0 = vld.sshfl [vmem:[#allocation1 + $0x10] sm:$0xff pattern:$0x73625140]  ;;  %v719_v1 = vld.sshfl [vmem:[#allocation1 + $0x18] sm:$0xff pattern:$0x73625140]  ;;  %v2906_v17 = vor.u32 %v3281_v2, %v2903_v6  ;;  %v2450_v25 = vor.u32 %v3167_v15, %v2447_v16 }
  0xf6   : > { %v3929_v4 = vpack.c.bf16 %v718_v0, %v718_v0  ;;  %v3931_v5 = vpack.c.bf16 %v719_v1, %v719_v1  ;;  %v716_v9 = vld.sshfl [vmem:[#allocation1] sm:$0xff pattern:$0x73625140]  ;;  %v717_v10 = vld.sshfl [vmem:[#allocation1 + $0x8] sm:$0xff pattern:$0x73625140] }
  0xf7   : > { %1846 = vmatpush.bf16.msrb.mxu3 %v2546_v29  ;;  %1857 = vmatpush.bf16.msrb.mxu0 %v2786_v33  ;;  %v3937_v12 = vpack.c.bf16 %v716_v9, %v716_v9  ;;  %v3939_v13 = vpack.c.bf16 %v717_v10, %v717_v10  ;;  %v3227_v19 = vld [vmem:[%s3831_s27 + $0x214] sm:$0xf]  ;;  %v2687_v20 = vld [vmem:[%s3831_s27 + $0x228] sm:$0xf0]  ;;  %v3305_v23 = vld [vmem:[%s3831_s27 + $0x484] sm:$0xf] }
  0xf8   : > { %1870 = vmatpush.bf16.msrb.mxu1 %v2978_v37  ;;  %1826 = vmatmul.bf16.vlgmr.msra.gmra.mxu2 %v3929_v4  ;;  %v3275_v21 = vld [vmem:[%s3831_s27 + $0x394] sm:$0xf]  ;;  %v2879_v22 = vld [vmem:[%s3831_s27 + $0x3a8] sm:$0xf0]  ;;  %v2999_v24 = vld [vmem:[%s3831_s27 + $0x498] sm:$0xf0]  ;;  %v2690_v28 = vor.u32 %v3227_v19, %v2687_v20 }
  0xf9   : > { %1886 = vmatpush.bf16.msrb.mxu2 %v1778_v38  ;;  %3115 = vmatmul.msk.bf16.vlgmr.msra.gmra.mxu3 %vm1766_vm2, %v3931_v5  ;;  %v2597_v26 = vld [vmem:[%s3831_s27 + $0x158] sm:$0xf]  ;;  %v3207_v27 = vld [vmem:[%s3831_s27 + $0x16c] sm:$0xf0]  ;;  %v3161_v29 = vld [vmem:[%s3831_s27 + $0x4] sm:$0xf]  ;;  %v2882_v32 = vor.u32 %v3275_v21, %v2879_v22  ;;  %v3002_v33 = vor.u32 %v3305_v23, %v2999_v24 }
  0xfa   : > { %1800 = vmatmul.bf16.vlgmr.msra.gmra.mxu0 %v3937_v12  ;;  %1813 = vmatmul.bf16.vlgmr.msra.gmra.mxu1 %v3939_v13  ;;  %v2423_v30 = vld [vmem:[%s3831_s27 + $0x18] sm:$0xf0]  ;;  %v2789_v31 = vld [vmem:[%s3831_s27 + $0x2d8] sm:$0xf]  ;;  %v3255_v34 = vld [vmem:[%s3831_s27 + $0x2ec] sm:$0xf0]  ;;  %v2598_v37 = vor.u32 %v3207_v27, %v2597_v26 }
  0xfb   : > { %1847 = vmatpush.bf16.msrb.mxu3 %v2522_v44  ;;  %1858 = vmatpush.bf16.msrb.mxu0 %v2762_v46  ;;  %v3221_v35 = vld [vmem:[%s3831_s27 + $0x1e4] sm:$0xf]  ;;  %v2663_v36 = vld [vmem:[%s3831_s27 + $0x1f8] sm:$0xf0]  ;;  %v2426_v40 = vor.u32 %v3161_v29, %v2423_v30  ;;  %v2573_v41 = vld [vmem:[%s3831_s27 + $0x128] sm:$0xf]  ;;  %v2790_v43 = vor.u32 %v3255_v34, %v2789_v31 }
  0xfc   : > { %1871 = vmatpush.bf16.msrb.mxu1 %v2954_v50  ;;  %v3269_v38 = vld [vmem:[%s3831_s27 + $0x364] sm:$0xf]  ;;  %v2855_v39 = vld [vmem:[%s3831_s27 + $0x378] sm:$0xf0]  ;;  %v3201_v42 = vld [vmem:[%s3831_s27 + $0x13c] sm:$0xf0]  ;;  %v2666_v44 = vor.u32 %v3221_v35, %v2663_v36 }
  0xfd   : > { %1887 = vmatpush.bf16.msrb.mxu2 %v3074_v51  ;;  %v2765_v45 = vld [vmem:[%s3831_s27 + $0x2a8] sm:$0xf]  ;;  %v2858_v46 = vor.u32 %v3269_v38, %v2855_v39  ;;  %v3249_v47 = vld [vmem:[%s3831_s27 + $0x2bc] sm:$0xf0]  ;;  %v3215_v48 = vld [vmem:[%s3831_s27 + $0x1b4] sm:$0xf]  ;;  %v2574_v50 = vor.u32 %v3201_v42, %v2573_v41 }
  0xfe   : > { %v2639_v49 = vld [vmem:[%s3831_s27 + $0x1c8] sm:$0xf0]  ;;  %v3263_v51 = vld [vmem:[%s3831_s27 + $0x334] sm:$0xf]  ;;  %v2549_v53 = vld [vmem:[%s3831_s27 + $0xf8] sm:$0xf]  ;;  %v2766_v58 = vor.u32 %v3249_v47, %v2765_v45 }
  0xff   : > { %1848 = vmatpush.bf16.msrb.mxu3 %v2498_v59  ;;  %1859 = vmatpush.bf16.msrb.mxu0 %v2738_v62  ;;  %v2831_v52 = vld [vmem:[%s3831_s27 + $0x348] sm:$0xf0]  ;;  %v3195_v55 = vld [vmem:[%s3831_s27 + $0x10c] sm:$0xf0]  ;;  %v3101_v56 = vld [vmem:[%s3831_s27 + $0x548] sm:$0xf]  ;;  %v2642_v59 = vor.u32 %v3215_v48, %v2639_v49 }
 0x100   : > { %1872 = vmatpush.bf16.msrb.mxu1 %v2930_v63  ;;  %v3333_v57 = vld [vmem:[%s3831_s27 + $0x55c] sm:$0x30]  ;;  %v2741_v60 = vld [vmem:[%s3831_s27 + $0x278] sm:$0xf]  ;;  %v3243_v61 = vld [vmem:[%s3831_s27 + $0x28c] sm:$0xf0]  ;;  %v2834_v62 = vor.u32 %v3263_v51, %v2831_v52  ;;  %v2550_v2 = vor.u32 %v3195_v55, %v2549_v53 }
 0x101   : > { %1888 = vmatpush.bf16.msrb.mxu2 %v3050_v3  ;;  %v3209_v63 = vld [vmem:[%s3831_s27 + $0x184] sm:$0xf]  ;;  %v2615_v0 = vld [vmem:[%s3831_s27 + $0x198] sm:$0xf0]  ;;  %v2981_v6 = vld [vmem:[%s3831_s27 + $0x458] sm:$0xf]  ;;  %v3102_v8 = vor.u32 %v3333_v57, %v3101_v56 }
 0x102   : > { %v3257_v1 = vld [vmem:[%s3831_s27 + $0x304] sm:$0xf]  ;;  %v2807_v3 = vld [vmem:[%s3831_s27 + $0x318] sm:$0xf0]  ;;  %v3303_v7 = vld [vmem:[%s3831_s27 + $0x46c] sm:$0xf0] }
 0x103   : > { %1849 = vmatpush.bf16.msrb.mxu3 %v2474_v11  ;;  %1860 = vmatpush.bf16.msrb.mxu0 %v2714_v14  ;;  %v2525_v9 = vld [vmem:[%s3831_s27 + $0xc8] sm:$0xf]  ;;  %v3189_v10 = vld [vmem:[%s3831_s27 + $0xdc] sm:$0xf0]  ;;  %v2742_v11 = vor.u32 %v3243_v61, %v2741_v60  ;;  %v2618_v14 = vor.u32 %v3209_v63, %v2615_v0  ;;  %v2810_v15 = vor.u32 %v3257_v1, %v2807_v3  ;;  %v2501_v21 = vld [vmem:[%s3831_s27 + $0x98] sm:$0xf] }
 0x104   : > { %1873 = vmatpush.bf16.msrb.mxu1 %v2906_v17  ;;  %v2982_v16 = vor.u32 %v3303_v7, %v2981_v6  ;;  %v2717_v17 = vld [vmem:[%s3831_s27 + $0x248] sm:$0xf]  ;;  %v2526_v19 = vor.u32 %v3189_v10, %v2525_v9  ;;  %v1781_v20 = vand.u32 %v3102_v8, %v3829_v54  ;;  %v3297_v23 = vld [vmem:[%s3831_s27 + $0x43c] sm:$0xf0]  ;;  %v3183_v24 = vld [vmem:[%s3831_s27 + $0xac] sm:$0xf0] }
 0x105   : > { %1889 = vmatpush.bf16.msrb.mxu2 %v3026_v18  ;;  %v3237_v18 = vld [vmem:[%s3831_s27 + $0x25c] sm:$0xf0]  ;;  %v2957_v22 = vld [vmem:[%s3831_s27 + $0x428] sm:$0xf]  ;;  %v3327_v26 = vld [vmem:[%s3831_s27 + $0x52c] sm:$0xf0]  ;;  %v2502_v31 = vor.u32 %v3183_v24, %v2501_v21 }
 0x106   : > { %v2718_v27 = vor.u32 %v3237_v18, %v2717_v17  ;;  %v2693_v29 = vld [vmem:[%s3831_s27 + $0x218] sm:$0xf]  ;;  %v3231_v30 = vld [vmem:[%s3831_s27 + $0x22c] sm:$0xf0]  ;;  %v3177_v36 = vld [vmem:[%s3831_s27 + $0x7c] sm:$0xf0] }
 0x107   : > { %1850 = vmatpush.bf16.msrb.mxu3 %v2450_v25  ;;  %1861 = vmatpush.bf16.msrb.mxu0 %v2690_v28  ;;  %v3077_v25 = vld [vmem:[%s3831_s27 + $0x518] sm:$0xf]  ;;  %v2958_v28 = vor.u32 %v3297_v23, %v2957_v22  ;;  %v3291_v35 = vld [vmem:[%s3831_s27 + $0x40c] sm:$0xf0]  ;;  %v3321_v38 = vld [vmem:[%s3831_s27 + $0x4fc] sm:$0xf0]  ;;  %v2694_v39 = vor.u32 %v3231_v30, %v2693_v29 }
 0x108   : > { %1874 = vmatpush.bf16.msrb.mxu1 %v2882_v32  ;;  %v3078_v32 = vor.u32 %v3327_v26, %v3077_v25  ;;  %v2933_v34 = vld [vmem:[%s3831_s27 + $0x3f8] sm:$0xf]  ;;  %v2669_v41 = vld [vmem:[%s3831_s27 + $0x1e8] sm:$0xf]  ;;  %v3225_v42 = vld [vmem:[%s3831_s27 + $0x1fc] sm:$0xf0] }
 0x109   : > { %1890 = vmatpush.bf16.msrb.mxu2 %v3002_v33  ;;  %v2477_v33 = vld [vmem:[%s3831_s27 + $0x68] sm:$0xf]  ;;  %v2453_v45 = vld [vmem:[%s3831_s27 + $0x38] sm:$0xf]  ;;  %v3285_v47 = vld [vmem:[%s3831_s27 + $0x3dc] sm:$0xf0]  ;;  %v2670_v51 = vor.u32 %v3225_v42, %v2669_v41 }
 0x10a   : > { %v3171_v48 = vld [vmem:[%s3831_s27 + $0x4c] sm:$0xf0]  ;;  %v3029_v49 = vld [vmem:[%s3831_s27 + $0x4b8] sm:$0xf]  ;;  %v2429_v56 = vld [vmem:[%s3831_s27 + $0x8] sm:$0xf] }
 0x10b   : > { %1851 = vmatpush.bf16.msrb.mxu3 %v2426_v40  ;;  %1862 = vmatpush.bf16.msrb.mxu0 %v2666_v44  ;;  %v2934_v40 = vor.u32 %v3291_v35, %v2933_v34  ;;  %v2645_v53 = vld [vmem:[%s3831_s27 + $0x1b8] sm:$0xf]  ;;  %v3219_v55 = vld [vmem:[%s3831_s27 + $0x1cc] sm:$0xf0]  ;;  %v2454_v57 = vor.u32 %v3171_v48, %v2453_v45  ;;  %v3309_v63 = vld [vmem:[%s3831_s27 + $0x49c] sm:$0xf0] }
 0x10c   : > { %1875 = vmatpush.bf16.msrb.mxu1 %v2858_v46  ;;  %3116 = vmatmul.msk.bf16.vlgmr.msrb.gmra.mxu2 %vm1766_vm2, %v3931_v5  ;;  %v2909_v46 = vld [vmem:[%s3831_s27 + $0x3c8] sm:$0xf]  ;;  %v2885_v60 = vld [vmem:[%s3831_s27 + $0x398] sm:$0xf]  ;;  %v3279_v61 = vld [vmem:[%s3831_s27 + $0x3ac] sm:$0xf0]  ;;  %v2646_v1 = vor.u32 %v3219_v55, %v2645_v53 }
 0x10d   : > { %1896 = vmatpush.bf16.msra.mxu2 %v2598_v37  ;;  %v3053_v37 = vld [vmem:[%s3831_s27 + $0x4e8] sm:$0xf]  ;;  %v2910_v52 = vor.u32 %v3285_v47, %v2909_v46  ;;  %v3204_v0 = vld [vmem:[%s3831_s27 + $0x15c] sm:$0xf]  ;;  %v2791_v6 = vld [vmem:[%s3831_s27 + $0x2f0] sm:$0xf0]  ;;  %v2886_v7 = vor.u32 %v3279_v61, %v2885_v60 }
 0x10e   : > { %1852 = vmatmul.bf16.vlgmr.msrb.gmra.mxu3 %v3937_v12  ;;  %v3054_v44 = vor.u32 %v3321_v38, %v3053_v37  ;;  %v3252_v3 = vld [vmem:[%s3831_s27 + $0x2dc] sm:$0xf]  ;;  %v2621_v8 = vld [vmem:[%s3831_s27 + $0x188] sm:$0xf]  ;;  %v3213_v9 = vld [vmem:[%s3831_s27 + $0x19c] sm:$0xf0] }
 0x10f   : > { %1909 = vmatpush.bf16.msra.mxu3 %v2790_v43  ;;  %1863 = vmatpush.bf16.msrb.mxu0 %v2642_v59  ;;  %v2478_v43 = vor.u32 %v3177_v36, %v2477_v33  ;;  %v3165_v59 = vld [vmem:[%s3831_s27 + $0x1c] sm:$0xf0]  ;;  %v3300_v10 = vld [vmem:[%s3831_s27 + $0x45c] sm:$0xf]  ;;  %v2622_v21 = vor.u32 %v3213_v9, %v2621_v8  ;;  %v2575_v22 = vld [vmem:[%s3831_s27 + $0x140] sm:$0xf0] }
 0x110   : > { %1876 = vmatpush.bf16.msrb.mxu1 %v2834_v62  ;;  %v3005_v62 = vld [vmem:[%s3831_s27 + $0x488] sm:$0xf]  ;;  %v3273_v17 = vld [vmem:[%s3831_s27 + $0x37c] sm:$0xf0]  ;;  %v3246_v23 = vld [vmem:[%s3831_s27 + $0x2ac] sm:$0xf] }
 0x111   : > { %1897 = vmatpush.bf16.msra.mxu2 %v2574_v50  ;;  %v3315_v50 = vld [vmem:[%s3831_s27 + $0x4cc] sm:$0xf0]  ;;  %v2767_v24 = vld [vmem:[%s3831_s27 + $0x2c0] sm:$0xf0]  ;;  %v2837_v29 = vld [vmem:[%s3831_s27 + $0x338] sm:$0xf] }
 0x112   : > { %v3267_v30 = vld [vmem:[%s3831_s27 + $0x34c] sm:$0xf0]  ;;  %v3192_v33 = vld [vmem:[%s3831_s27 + $0xfc] sm:$0xf]  ;;  %v3330_v34 = vld [vmem:[%s3831_s27 + $0x54c] sm:$0xf] }
 0x113   : > { %1910 = vmatpush.bf16.msra.mxu3 %v2766_v58  ;;  %1864 = vmatpush.bf16.msrb.mxu0 %v2618_v14  ;;  %v3030_v58 = vor.u32 %v3315_v50, %v3029_v49  ;;  %v3006_v14 = vor.u32 %v3309_v63, %v3005_v62  ;;  %v3103_v35 = vld [vmem:[%s3831_s27 + $0x560] sm:$0x30]  ;;  %v2551_v36 = vld [vmem:[%s3831_s27 + $0x110] sm:$0xf0]  ;;  %v3240_v37 = vld [vmem:[%s3831_s27 + $0x27c] sm:$0xf] }
 0x114   : > { %1877 = vmatpush.bf16.msrb.mxu1 %v2810_v15  ;;  %v2983_v15 = vld [vmem:[%s3831_s27 + $0x470] sm:$0xf0]  ;;  %v3288_v41 = vld [vmem:[%s3831_s27 + $0x3fc] sm:$0xf]  ;;  %v3106_v45 = vor.u32 %v3330_v34, %v3103_v35  ;;  %v2554_v46 = vor.u32 %v3192_v33, %v2551_v36  ;;  %v3186_v48 = vld [vmem:[%s3831_s27 + $0xcc] sm:$0xf] }
 0x115   : > { %1898 = vmatpush.bf16.msra.mxu2 %v2550_v2  ;;  %v2599_v2 = vld [vmem:[%s3831_s27 + $0x170] sm:$0xf0]  ;;  %v2986_v25 = vor.u32 %v3300_v10, %v2983_v15  ;;  %v2527_v49 = vld [vmem:[%s3831_s27 + $0xe0] sm:$0xf0]  ;;  %v3234_v50 = vld [vmem:[%s3831_s27 + $0x24c] sm:$0xf] }
 0x116   : > { %1865 = vmatmul.bf16.vlgmr.msrb.gmra.mxu0 %v3939_v13  ;;  %v2602_v18 = vor.u32 %v3204_v0, %v2599_v2  ;;  %v2743_v38 = vld [vmem:[%s3831_s27 + $0x290] sm:$0xf0]  ;;  %v1784_v55 = vand.u32 %v3106_v45, %v3829_v54  ;;  %v3180_v60 = vld [vmem:[%s3831_s27 + $0x9c] sm:$0xf]  ;;  %v3174_v10 = vld [vmem:[%s3831_s27 + $0x6c] sm:$0xf] }
 0x117   : > { %1911 = vmatpush.bf16.msra.mxu3 %v2742_v11  ;;  %1922 = vmatpush.bf16.msra.mxu0 %v2982_v16  ;;  %v2430_v11 = vor.u32 %v3165_v59, %v2429_v56  ;;  %v2861_v16 = vld [vmem:[%s3831_s27 + $0x368] sm:$0xf]  ;;  %v2935_v42 = vld [vmem:[%s3831_s27 + $0x410] sm:$0xf0]  ;;  %v2746_v47 = vor.u32 %v3240_v37, %v2743_v38  ;;  %v3282_v56 = vld [vmem:[%s3831_s27 + $0x3cc] sm:$0xf] }
 0x118   : > { %1938 = vmatpush.bf16.msra.mxu1 %v1781_v20  ;;  %v3198_v20 = vld [vmem:[%s3831_s27 + $0x12c] sm:$0xf]  ;;  %v2862_v26 = vor.u32 %v3273_v17, %v2861_v16  ;;  %v3324_v61 = vld [vmem:[%s3831_s27 + $0x51c] sm:$0xf]  ;;  %v3079_v62 = vld [vmem:[%s3831_s27 + $0x530] sm:$0xf0] }
 0x119   : > { %1899 = vmatpush.bf16.msra.mxu2 %v2526_v19  ;;  %1878 = vmatmul.bf16.vlgmr.msrb.gmra.mxu1 %v3929_v4  ;;  %v2794_v19 = vor.u32 %v3252_v3, %v2791_v6  ;;  %v2503_v63 = vld [vmem:[%s3831_s27 + $0xb0] sm:$0xf0]  ;;  %v3228_v0 = vld [vmem:[%s3831_s27 + $0x21c] sm:$0xf]  ;;  %v3082_v3 = vor.u32 %v3324_v61, %v3079_v62  ;;  %v2479_v15 = vld [vmem:[%s3831_s27 + $0x80] sm:$0xf0] }
 0x11a   : > { %v3276_v6 = vld [vmem:[%s3831_s27 + $0x39c] sm:$0xf]  ;;  %v2506_v8 = vor.u32 %v3180_v60, %v2503_v63  ;;  %v3222_v16 = vld [vmem:[%s3831_s27 + $0x1ec] sm:$0xf]  ;;  %v2671_v17 = vld [vmem:[%s3831_s27 + $0x200] sm:$0xf0] }
 0x11b   : > { %1912 = vmatpush.bf16.msra.mxu3 %v2718_v27  ;;  %1923 = vmatpush.bf16.msra.mxu0 %v2958_v28  ;;  %v3294_v27 = vld [vmem:[%s3831_s27 + $0x42c] sm:$0xf]  ;;  %v2959_v28 = vld [vmem:[%s3831_s27 + $0x440] sm:$0xf0]  ;;  %v3208_v45 = vld [vmem:[%s3831_s27 + $0x174] sm:$0xf0] }
 0x11c   : > { %1939 = vmatpush.bf16.msra.mxu1 %v3078_v32  ;;  %v2770_v32 = vor.u32 %v3246_v23, %v2767_v24  ;;  %v2674_v23 = vor.u32 %v3222_v16, %v2671_v17  ;;  %v3168_v24 = vld [vmem:[%s3831_s27 + $0x3c] sm:$0xf]  ;;  %v3162_v34 = vld [vmem:[%s3831_s27 + $0xc] sm:$0xf]  ;;  %v2431_v35 = vld [vmem:[%s3831_s27 + $0x20] sm:$0xf0] }
 0x11d   : > { %1900 = vmatpush.bf16.msra.mxu2 %v2502_v31  ;;  %v2578_v31 = vor.u32 %v3198_v20, %v2575_v22  ;;  %v3270_v20 = vld [vmem:[%s3831_s27 + $0x36c] sm:$0xf]  ;;  %v2482_v22 = vor.u32 %v3174_v10, %v2479_v15  ;;  %v2581_v60 = vld [vmem:[%s3831_s27 + $0x130] sm:$0xf]  ;;  %v3202_v63 = vld [vmem:[%s3831_s27 + $0x144] sm:$0xf0] }
 0x11e   : > { %v3210_v36 = vld [vmem:[%s3831_s27 + $0x18c] sm:$0xf]  ;;  %v3196_v15 = vld [vmem:[%s3831_s27 + $0x114] sm:$0xf0]  ;;  %v2749_v16 = vld [vmem:[%s3831_s27 + $0x280] sm:$0xf] }
 0x11f   : > { %1913 = vmatpush.bf16.msra.mxu3 %v2694_v39  ;;  %1924 = vmatpush.bf16.msra.mxu0 %v2934_v40  ;;  %v2962_v39 = vor.u32 %v3294_v27, %v2959_v28  ;;  %v2838_v40 = vor.u32 %v3267_v30, %v2837_v29  ;;  %v2455_v27 = vld [vmem:[%s3831_s27 + $0x50] sm:$0xf0]  ;;  %v3216_v28 = vld [vmem:[%s3831_s27 + $0x1bc] sm:$0xf]  ;;  %v3306_v37 = vld [vmem:[%s3831_s27 + $0x48c] sm:$0xf] }
 0x120   : > { %1940 = vmatpush.bf16.msra.mxu1 %v3054_v44  ;;  %v3261_v44 = vld [vmem:[%s3831_s27 + $0x31c] sm:$0xf0]  ;;  %v2647_v29 = vld [vmem:[%s3831_s27 + $0x1d0] sm:$0xf0]  ;;  %v2458_v38 = vor.u32 %v3168_v24, %v2455_v27  ;;  %v3244_v17 = vld [vmem:[%s3831_s27 + $0x294] sm:$0xf0] }
 0x121   : > { %1901 = vmatpush.bf16.msra.mxu2 %v2478_v43  ;;  %v2813_v43 = vld [vmem:[%s3831_s27 + $0x308] sm:$0xf]  ;;  %v2750_v24 = vor.u32 %v3244_v17, %v2749_v16  ;;  %s2417_s23 = sshll.u32 %s4311_s10, 1  ;;  %vm2254_vm5 = vcmask 1045508   ;;  %vm2256_vm6 = vcmask 1043456  }
 0x122   : > { %v2814_v53 = vor.u32 %v3261_v44, %v2813_v43  ;;  %v2623_v43 = vld [vmem:[%s3831_s27 + $0x1a0] sm:$0xf0]  ;;  %v2605_v44 = vld [vmem:[%s3831_s27 + $0x160] sm:$0xf]  ;;  %v3190_v27 = vld [vmem:[%s3831_s27 + $0xe4] sm:$0xf0]  ;;  %s696_s15 = scalar_lea.vmem %s4304_s5, %s2417_s23  ;;  %s702_s18 = scalar_lea.vmem %s4305_s6, %s2417_s23 }
 0x123   : > { %1914 = vmatpush.bf16.msra.mxu3 %v2670_v51  ;;  %1925 = vmatpush.bf16.msra.mxu0 %v2910_v52  ;;  %v2719_v51 = vld [vmem:[%s3831_s27 + $0x260] sm:$0xf0]  ;;  %v2938_v52 = vor.u32 %v3288_v41, %v2935_v42  ;;  %v3109_v41 = vld [vmem:[%s3831_s27 + $0x550] sm:$0xf]  ;;  %v3334_v42 = vld [vmem:[%s3831_s27 + $0x564] sm:$0x30] }
 0x124   : > { %1941 = vmatpush.bf16.msra.mxu1 %v3030_v58  ;;  %v2530_v58 = vor.u32 %v3186_v48, %v2527_v49  ;;  %v2722_v59 = vor.u32 %v3234_v50, %v2719_v51  ;;  %v3256_v48 = vld [vmem:[%s3831_s27 + $0x2f4] sm:$0xf0]  ;;  %v2989_v49 = vld [vmem:[%s3831_s27 + $0x460] sm:$0xf] }
 0x125   : > { %1902 = vmatpush.bf16.msra.mxu2 %v2454_v57  ;;  %v2911_v57 = vld [vmem:[%s3831_s27 + $0x3e0] sm:$0xf0]  ;;  %v3304_v51 = vld [vmem:[%s3831_s27 + $0x474] sm:$0xf0] }
 0x126   : > { %v2914_v2 = vor.u32 %v3282_v56, %v2911_v57  ;;  %v2434_v56 = vor.u32 %v3162_v34, %v2431_v35  ;;  %v2626_v57 = vor.u32 %v3210_v36, %v2623_v43  ;;  %v2990_v61 = vor.u32 %v3304_v51, %v2989_v49  ;;  %v3316_v34 = vld [vmem:[%s3831_s27 + $0x4d4] sm:$0xf0]  ;;  %v2893_v43 = vld [vmem:[%s3831_s27 + $0x3a0] sm:$0xf]  ;;  %v3205_v49 = vld [vmem:[%s3831_s27 + $0x164] sm:$0xf] }
 0x127   : > { %1915 = vmatpush.bf16.msra.mxu3 %v2646_v1  ;;  %1926 = vmatpush.bf16.msra.mxu0 %v2886_v7  ;;  %v2695_v1 = vld [vmem:[%s3831_s27 + $0x230] sm:$0xf0]  ;;  %v2485_v51 = vld [vmem:[%s3831_s27 + $0x70] sm:$0xf] }
 0x128   : > { %1942 = vmatpush.bf16.msra.mxu1 %v3006_v14  ;;  %v2887_v7 = vld [vmem:[%s3831_s27 + $0x3b0] sm:$0xf0]  ;;  %v2698_v9 = vor.u32 %v3228_v0, %v2695_v1  ;;  %v3055_v14 = vld [vmem:[%s3831_s27 + $0x500] sm:$0xf0]  ;;  %v2773_v0 = vld [vmem:[%s3831_s27 + $0x2b0] sm:$0xf] }
 0x129   : > { %1903 = vmatpush.bf16.msra.mxu2 %v2430_v11  ;;  %v3318_v11 = vld [vmem:[%s3831_s27 + $0x4ec] sm:$0xf]  ;;  %v3250_v1 = vld [vmem:[%s3831_s27 + $0x2c4] sm:$0xf0] }
 0x12a   : > { %v2774_v10 = vor.u32 %v3250_v1, %v2773_v0  ;;  %v2583_v0 = vld [vmem:[%s3831_s27 + $0x148] sm:$0xf0]  ;;  %v2461_v1 = vld [vmem:[%s3831_s27 + $0x40] sm:$0xf] }
 0x12b   : > { %1916 = vmatpush.bf16.msra.mxu3 %v2622_v21  ;;  %1927 = vmatpush.bf16.msra.mxu0 %v2862_v26  ;;  %v2863_v21 = vld [vmem:[%s3831_s27 + $0x380] sm:$0xf0]  ;;  %v3031_v26 = vld [vmem:[%s3831_s27 + $0x4d0] sm:$0xf0] }
 0x12c   : > { %1948 = vmatpush.bf16.msrb.mxu1 %v2602_v18  ;;  %1904 = vmatmul.bf16.vlgmr.msra.gmra.mxu2 %v3937_v12  ;;  %v2890_v18 = vor.u32 %v3276_v6, %v2887_v7  ;;  %v2866_v30 = vor.u32 %v3270_v20, %v2863_v21  ;;  %v3298_v6 = vld [vmem:[%s3831_s27 + $0x444] sm:$0xf0]  ;;  %v3085_v7 = vld [vmem:[%s3831_s27 + $0x520] sm:$0xf]  ;;  %v3292_v20 = vld [vmem:[%s3831_s27 + $0x414] sm:$0xf0] }
 0x12d   : > { %1961 = vmatpush.bf16.msrb.mxu2 %v2794_v19  ;;  %3117 = vmatmul.msk.bf16.vlgmr.msra.gmra.mxu1 %vm1766_vm2, %v3931_v5  ;;  %v3058_v19 = vor.u32 %v3318_v11, %v3055_v14  ;;  %v2557_v11 = vld [vmem:[%s3831_s27 + $0x100] sm:$0xf]  ;;  %v3061_v21 = vld [vmem:[%s3831_s27 + $0x4f0] sm:$0xf] }
 0x12e   : > { %1917 = vmatmul.bf16.vlgmr.msra.gmra.mxu3 %v3939_v13 }
 0x12f   : > { %1974 = vmatpush.bf16.msrb.mxu3 %v2986_v25  ;;  %1928 = vmatpush.bf16.msra.mxu0 %v2838_v40  ;;  %v3312_v25 = vld [vmem:[%s3831_s27 + $0x4bc] sm:$0xf]  ;;  %v3007_v40 = vld [vmem:[%s3831_s27 + $0x4a0] sm:$0xf0] }
 0x130   : > { %1949 = vmatpush.bf16.msrb.mxu1 %v2578_v31  ;;  %v3264_v31 = vld [vmem:[%s3831_s27 + $0x33c] sm:$0xf]  ;;  %v3034_v33 = vor.u32 %v3312_v25, %v3031_v26  ;;  %v3010_v50 = vor.u32 %v3306_v37, %v3007_v40  ;;  %v2533_v25 = vld [vmem:[%s3831_s27 + $0xd0] sm:$0xf]  ;;  %v2509_v37 = vld [vmem:[%s3831_s27 + $0xa0] sm:$0xf] }
 0x131   : > { %1962 = vmatpush.bf16.msrb.mxu2 %v2770_v32  ;;  %v2839_v32 = vld [vmem:[%s3831_s27 + $0x350] sm:$0xf0]  ;;  %v2534_v35 = vor.u32 %v3190_v27, %v2533_v25  ;;  %v2701_v40 = vld [vmem:[%s3831_s27 + $0x220] sm:$0xf]  ;;  %v3262_v25 = vld [vmem:[%s3831_s27 + $0x324] sm:$0xf0] }
 0x132   : > { %v2799_v27 = vld [vmem:[%s3831_s27 + $0x2f8] sm:$0xf0] }
 0x133   : > { %1975 = vmatpush.bf16.msrb.mxu3 %v2962_v39  ;;  %1929 = vmatpush.bf16.msra.mxu0 %v2814_v53  ;;  %v2650_v39 = vor.u32 %v3216_v28, %v2647_v29  ;;  %v2815_v53 = vld [vmem:[%s3831_s27 + $0x320] sm:$0xf0]  ;;  %v2725_v28 = vld [vmem:[%s3831_s27 + $0x250] sm:$0xf]  ;;  %v3238_v29 = vld [vmem:[%s3831_s27 + $0x264] sm:$0xf0] }
 0x134   : > { %1950 = vmatpush.bf16.msrb.mxu1 %v2554_v46  ;;  %v2842_v46 = vor.u32 %v3264_v31, %v2839_v32  ;;  %v2917_v31 = vld [vmem:[%s3831_s27 + $0x3d0] sm:$0xf]  ;;  %v3286_v32 = vld [vmem:[%s3831_s27 + $0x3e4] sm:$0xf0]  ;;  %v2726_v36 = vor.u32 %v3238_v29, %v2725_v28 }
 0x135   : > { %1963 = vmatpush.bf16.msrb.mxu2 %v2746_v47  ;;  %v2797_v47 = vld [vmem:[%s3831_s27 + $0x2e0] sm:$0xf] }
 0x136   : > { %1930 = vmatmul.bf16.vlgmr.msra.gmra.mxu0 %v3929_v4 }
 0x137   : > { %1976 = vmatpush.bf16.msrb.mxu3 %v2938_v52  ;;  %1990 = vmatpush.bf16.msrb.mxu0 %v1784_v55  ;;  %v3258_v52 = vld [vmem:[%s3831_s27 + $0x30c] sm:$0xf]  ;;  %v3110_v55 = vor.u32 %v3334_v42, %v3109_v41  ;;  %v3232_v41 = vld [vmem:[%s3831_s27 + $0x234] sm:$0xf0] }
 0x138   : > { %1951 = vmatpush.bf16.msrb.mxu1 %v2530_v58  ;;  %v2606_v58 = vor.u32 %v3208_v45, %v2605_v44  ;;  %v2818_v62 = vor.u32 %v3258_v52, %v2815_v53  ;;  %v3280_v44 = vld [vmem:[%s3831_s27 + $0x3b4] sm:$0xf0]  ;;  %v3013_v45 = vld [vmem:[%s3831_s27 + $0x490] sm:$0xf]  ;;  %v3178_v53 = vld [vmem:[%s3831_s27 + $0x84] sm:$0xf0] }
 0x139   : > { %1964 = vmatpush.bf16.msrb.mxu2 %v2722_v59  ;;  %v2798_v59 = vor.u32 %v3256_v48, %v2797_v47  ;;  %v2702_v48 = vor.u32 %v3232_v41, %v2701_v40  ;;  %v2894_v52 = vor.u32 %v3280_v44, %v2893_v43  ;;  %v3247_v40 = vld [vmem:[%s3831_s27 + $0x2b4] sm:$0xf]  ;;  %v2775_v41 = vld [vmem:[%s3831_s27 + $0x2c8] sm:$0xf0] }
 0x13a   : > { %v2967_v44 = vld [vmem:[%s3831_s27 + $0x448] sm:$0xf0] }
 0x13b   : > { %1977 = vmatpush.bf16.msrb.mxu3 %v2914_v2  ;;  %1991 = vmatpush.bf16.msrb.mxu0 %v3082_v3  ;;  %v1787_v2 = vand.u32 %v3110_v55, %v3829_v54  ;;  %v2965_v3 = vld [vmem:[%s3831_s27 + $0x430] sm:$0xf] }
 0x13c   : > { %1952 = vmatpush.bf16.msrb.mxu1 %v2506_v8  ;;  %v3328_v8 = vld [vmem:[%s3831_s27 + $0x534] sm:$0xf0]  ;;  %v2966_v14 = vor.u32 %v3298_v6, %v2965_v3  ;;  %v2677_v55 = vld [vmem:[%s3831_s27 + $0x1f0] sm:$0xf]  ;;  %v2653_v6 = vld [vmem:[%s3831_s27 + $0x1c0] sm:$0xf] }
 0x13d   : > { %1965 = vmatpush.bf16.msrb.mxu2 %v2698_v9  ;;  %v2582_v9 = vor.u32 %v3202_v63, %v2581_v60  ;;  %v3199_v63 = vld [vmem:[%s3831_s27 + $0x134] sm:$0xf]  ;;  %v3172_v3 = vld [vmem:[%s3831_s27 + $0x54] sm:$0xf0] }
 0x13e   : > { %v2462_v16 = vor.u32 %v3172_v3, %v2461_v1  ;;  %v2727_v1 = vld [vmem:[%s3831_s27 + $0x268] sm:$0xf0] }
 0x13f   : > { %1978 = vmatpush.bf16.msrb.mxu3 %v2890_v18  ;;  %1992 = vmatpush.bf16.msrb.mxu0 %v3058_v19  ;;  %v3086_v18 = vor.u32 %v3328_v8, %v3085_v7  ;;  %v2941_v19 = vld [vmem:[%s3831_s27 + $0x400] sm:$0xf]  ;;  %v3220_v7 = vld [vmem:[%s3831_s27 + $0x1d4] sm:$0xf0] }
 0x140   : > { %1953 = vmatpush.bf16.msrb.mxu1 %v2482_v22  ;;  %v3322_v22 = vld [vmem:[%s3831_s27 + $0x504] sm:$0xf0]  ;;  %v2942_v26 = vor.u32 %v3292_v20, %v2941_v19  ;;  %v2845_v8 = vld [vmem:[%s3831_s27 + $0x340] sm:$0xf]  ;;  %v2654_v17 = vor.u32 %v3220_v7, %v2653_v6  ;;  %v2437_v19 = vld [vmem:[%s3831_s27 + $0x10] sm:$0xf] }
 0x141   : > { %1966 = vmatpush.bf16.msrb.mxu2 %v2674_v23  ;;  %v2558_v23 = vor.u32 %v3196_v15, %v2557_v11  ;;  %v3193_v11 = vld [vmem:[%s3831_s27 + $0x104] sm:$0xf]  ;;  %v3111_v15 = vld [vmem:[%s3831_s27 + $0x568] sm:$0x30]  ;;  %v3166_v20 = vld [vmem:[%s3831_s27 + $0x24] sm:$0xf0] }
 0x142   : > { %v2919_v6 = vld [vmem:[%s3831_s27 + $0x3e8] sm:$0xf0]  ;;  %v3313_v7 = vld [vmem:[%s3831_s27 + $0x4c4] sm:$0xf] }
 0x143   : > { %1979 = vmatpush.bf16.msrb.mxu3 %v2866_v30  ;;  %1993 = vmatpush.bf16.msrb.mxu0 %v3034_v33  ;;  %v3062_v30 = vor.u32 %v3322_v22, %v3061_v21  ;;  %v3037_v33 = vld [vmem:[%s3831_s27 + $0x4c0] sm:$0xf]  ;;  %v2629_v22 = vld [vmem:[%s3831_s27 + $0x190] sm:$0xf] }
 0x144   : > { %1954 = vmatpush.bf16.msrb.mxu1 %v2458_v38  ;;  %v2918_v38 = vor.u32 %v3286_v32, %v2917_v31  ;;  %v3038_v42 = vor.u32 %v3316_v34, %v3037_v33  ;;  %v2991_v31 = vld [vmem:[%s3831_s27 + $0x478] sm:$0xf0]  ;;  %v2438_v32 = vor.u32 %v3166_v20, %v2437_v19  ;;  %v3187_v34 = vld [vmem:[%s3831_s27 + $0xd4] sm:$0xf]  ;;  %v3277_v20 = vld [vmem:[%s3831_s27 + $0x3a4] sm:$0xf] }
 0x145   : > { %1967 = vmatpush.bf16.msrb.mxu2 %v2650_v39  ;;  %v3184_v39 = vld [vmem:[%s3831_s27 + $0xb4] sm:$0xf0] }
 0x146   : > { %v2510_v47 = vor.u32 %v3184_v39, %v2509_v37 }
 0x147   : > { %1980 = vmatpush.bf16.msrb.mxu3 %v2842_v46  ;;  %1994 = vmatpush.bf16.msrb.mxu0 %v3010_v50  ;;  %v3310_v46 = vld [vmem:[%s3831_s27 + $0x4a4] sm:$0xf0]  ;;  %v2607_v50 = vld [vmem:[%s3831_s27 + $0x178] sm:$0xf0] }
 0x148   : > { %1955 = vmatpush.bf16.msrb.mxu1 %v2434_v56  ;;  %v3226_v56 = vld [vmem:[%s3831_s27 + $0x204] sm:$0xf0]  ;;  %v2610_v60 = vor.u32 %v3205_v49, %v2607_v50 }
 0x149   : > { %1968 = vmatpush.bf16.msrb.mxu2 %v2626_v57  ;;  %v3014_v57 = vor.u32 %v3310_v46, %v3013_v45  ;;  %v3325_v45 = vld [vmem:[%s3831_s27 + $0x524] sm:$0xf]  ;;  %v3087_v46 = vld [vmem:[%s3831_s27 + $0x538] sm:$0xf0] }
 0x14a   : > { %3118 = vmatmul.msk.bf16.vlgmr.msrb.gmra.mxu0 %vm1766_vm2, %v3931_v5  ;;  %v3090_v50 = vor.u32 %v3325_v45, %v3087_v46 }
 0x14b   : > { %2000 = vmatpush.bf16.msra.mxu0 %v2606_v58  ;;  %1981 = vmatpush.bf16.msrb.mxu3 %v2818_v62  ;;  %v2869_v58 = vld [vmem:[%s3831_s27 + $0x370] sm:$0xf]  ;;  %v2678_v62 = vor.u32 %v3226_v56, %v2677_v55  ;;  %v2943_v56 = vld [vmem:[%s3831_s27 + $0x418] sm:$0xf0] }
 0x14c   : > { %2013 = vmatpush.bf16.msra.mxu1 %v2798_v59  ;;  %1969 = vmatmul.bf16.vlgmr.msrb.gmra.mxu2 %v3939_v13  ;;  %v3274_v59 = vld [vmem:[%s3831_s27 + $0x384] sm:$0xf0] }
 0x14d   : > { %2026 = vmatpush.bf16.msra.mxu2 %v2990_v61  ;;  %1956 = vmatmul.bf16.vlgmr.msrb.gmra.mxu1 %v3937_v12  ;;  %v2486_v61 = vor.u32 %v3178_v53, %v2485_v51  ;;  %v3241_v51 = vld [vmem:[%s3831_s27 + $0x284] sm:$0xf] }
 0x14e   : > { %1982 = vmatmul.bf16.vlgmr.msrb.gmra.mxu3 %v3929_v4  ;;  %v3289_v53 = vld [vmem:[%s3831_s27 + $0x404] sm:$0xf] }
 0x14f   : > { %2042 = vmatpush.bf16.msra.mxu3 %v1787_v2  ;;  %2001 = vmatpush.bf16.msra.mxu0 %v2582_v9  ;;  %v2870_v2 = vor.u32 %v3274_v59, %v2869_v58  ;;  %v3268_v9 = vld [vmem:[%s3831_s27 + $0x354] sm:$0xf0]  ;;  %v3063_v58 = vld [vmem:[%s3831_s27 + $0x508] sm:$0xf0]  ;;  %v3175_v59 = vld [vmem:[%s3831_s27 + $0x74] sm:$0xf] }
 0x150   : > { %2014 = vmatpush.bf16.msra.mxu1 %v2774_v10  ;;  %v2586_v10 = vor.u32 %v3199_v63, %v2583_v0  ;;  %v2846_v21 = vor.u32 %v3268_v9, %v2845_v8  ;;  %v3235_v0 = vld [vmem:[%s3831_s27 + $0x254] sm:$0xf]  ;;  %v3039_v8 = vld [vmem:[%s3831_s27 + $0x4d8] sm:$0xf0]  ;;  %v3169_v9 = vld [vmem:[%s3831_s27 + $0x44] sm:$0xf] }
 0x151   : > { %2027 = vmatpush.bf16.msra.mxu2 %v2966_v14  ;;  %v3331_v14 = vld [vmem:[%s3831_s27 + $0x554] sm:$0xf]  ;;  %v3042_v19 = vor.u32 %v3313_v7, %v3039_v8 }
 0x152   : > { %v3114_v28 = vor.u32 %v3331_v14, %v3111_v15  ;;  %v2730_v14 = vor.u32 %v3235_v0, %v2727_v1  ;;  %v2703_v15 = vld [vmem:[%s3831_s27 + $0x238] sm:$0xf0]  ;;  %v2823_v0 = vld [vmem:[%s3831_s27 + $0x328] sm:$0xf0] }
 0x153   : > { %2043 = vmatpush.bf16.msra.mxu3 %v3086_v18  ;;  %2002 = vmatpush.bf16.msra.mxu0 %v2558_v23  ;;  %v2559_v18 = vld [vmem:[%s3831_s27 + $0x118] sm:$0xf0]  ;;  %v3214_v23 = vld [vmem:[%s3831_s27 + $0x1a4] sm:$0xf0] }
 0x154   : > { %2015 = vmatpush.bf16.msra.mxu1 %v2750_v24  ;;  %v2821_v24 = vld [vmem:[%s3831_s27 + $0x310] sm:$0xf]  ;;  %v2562_v29 = vor.u32 %v3193_v11, %v2559_v18  ;;  %v2630_v33 = vor.u32 %v3214_v23, %v2629_v22  ;;  %v1790_v39 = vand.u32 %v3114_v28, %v3829_v54  ;;  %v2778_v54 = vor.u32 %v3247_v40, %v2775_v41  ;;  %v3229_v11 = vld [vmem:[%s3831_s27 + $0x224] sm:$0xf]  ;;  %v3125_v22 = vld [vmem:[%s4210_s21 + $0x18] sm:$0x10] }
 0x155   : > { %2028 = vmatpush.bf16.msra.mxu2 %v2942_v26  ;;  %v3253_v26 = vld [vmem:[%s3831_s27 + $0x2e4] sm:$0xf]  ;;  %v2439_v28 = vld [vmem:[%s3831_s27 + $0x28] sm:$0xf0]  ;;  %v3271_v41 = vld [vmem:[%s3831_s27 + $0x374] sm:$0xf] }
 0x156   : > { %v2802_v37 = vor.u32 %v3253_v26, %v2799_v27  ;;  %v3015_v26 = vld [vmem:[%s3831_s27 + $0x4a8] sm:$0xf0]  ;;  %v3163_v27 = vld [vmem:[%s3831_s27 + $0x14] sm:$0xf] }
 0x157   : > { %2044 = vmatpush.bf16.msra.mxu3 %v3062_v30  ;;  %2003 = vmatpush.bf16.msra.mxu0 %v2534_v35  ;;  %v3301_v30 = vld [vmem:[%s3831_s27 + $0x464] sm:$0xf]  ;;  %v2535_v35 = vld [vmem:[%s3831_s27 + $0xe8] sm:$0xf0]  ;;  %v2442_v40 = vor.u32 %v3163_v27, %v2439_v28 }
 0x158   : > { %2016 = vmatpush.bf16.msra.mxu1 %v2726_v36  ;;  %v2822_v36 = vor.u32 %v3262_v25, %v2821_v24  ;;  %v2538_v43 = vor.u32 %v3187_v34, %v2535_v35  ;;  %v2895_v24 = vld [vmem:[%s3831_s27 + $0x3b8] sm:$0xf0]  ;;  %v3307_v25 = vld [vmem:[%s3831_s27 + $0x494] sm:$0xf]  ;;  %v3141_v35 = vld [vmem:[%s4210_s21 + $0x28] sm:$0x10] }
 0x159   : > { %2029 = vmatpush.bf16.msra.mxu2 %v2918_v38  ;;  %v2994_v38 = vor.u32 %v3301_v30, %v2991_v31  ;;  %v3139_v30 = vld [vmem:[%s4210_s21 + $0x10] sm:$0xf]  ;;  %v2706_v31 = vor.u32 %v3229_v11, %v2703_v15  ;;  %v3157_v34 = vld [vmem:[%s4210_s21 + $0x14] sm:$0xf] }
 0x15a   : > { %v3144_v45 = vor.u32 %v3157_v34, %v3141_v35 }
 0x15b   : > { %2045 = vmatpush.bf16.msra.mxu3 %v3038_v42  ;;  %2004 = vmatpush.bf16.msra.mxu0 %v2510_v47  ;;  %v3295_v42 = vld [vmem:[%s3831_s27 + $0x434] sm:$0xf]  ;;  %v3181_v47 = vld [vmem:[%s3831_s27 + $0xa4] sm:$0xf] }
 0x15c   : > { %2017 = vmatpush.bf16.msra.mxu1 %v2702_v48  ;;  %v2511_v48 = vld [vmem:[%s3831_s27 + $0xb8] sm:$0xf0]  ;;  %v2970_v49 = vor.u32 %v3295_v42, %v2967_v44  ;;  %v2871_v42 = vld [vmem:[%s3831_s27 + $0x388] sm:$0xf0] }
 0x15d   : > { %2030 = vmatpush.bf16.msra.mxu2 %v2894_v52  ;;  %v2751_v52 = vld [vmem:[%s3831_s27 + $0x298] sm:$0xf0]  ;;  %v2514_v55 = vor.u32 %v3181_v47, %v2511_v48  ;;  %v2874_v48 = vor.u32 %v3271_v41, %v2871_v42 }
 0x15f   : > { %2046 = vmatpush.bf16.msra.mxu3 %v3014_v57  ;;  %2005 = vmatpush.bf16.msra.mxu0 %v2486_v61  ;;  %v3319_v57 = vld [vmem:[%s3831_s27 + $0x4f4] sm:$0xf]  ;;  %v2754_v61 = vor.u32 %v3241_v51, %v2751_v52  ;;  %v2847_v51 = vld [vmem:[%s3831_s27 + $0x358] sm:$0xf0] }
 0x160   : > { %2018 = vmatpush.bf16.msra.mxu1 %v2678_v62  ;;  %v2946_v62 = vor.u32 %v3289_v53, %v2943_v56  ;;  %v3066_v63 = vor.u32 %v3319_v57, %v3063_v58  ;;  %v2162_v53 = vsel %vm1770_vm0, %v3144_v45, 0  ;;  %v3159_v56 = vld [vmem:[%s4210_s21 + $0x1c] sm:$0x10]  ;;  %v3156_v58 = vld [vmem:[%s4210_s21 + $0xc] sm:$0xf] }
 0x161   : > { %2031 = vmatpush.bf16.msra.mxu2 %v2870_v2  ;;  %v3283_v2 = vld [vmem:[%s3831_s27 + $0x3d4] sm:$0xf] }
 0x162   : > { %3119 = vmatmul.msk.bf16.vlgmr.msra.gmra.mxu3 %vm1766_vm2, %v3931_v5  ;;  %v2922_v18 = vor.u32 %v3283_v2, %v2919_v6 }
 0x163   : > { %2052 = vmatpush.bf16.msrb.mxu3 %v2610_v60  ;;  %2006 = vmatpush.bf16.msra.mxu0 %v2462_v16  ;;  %v2487_v60 = vld [vmem:[%s3831_s27 + $0x88] sm:$0xf0]  ;;  %v3123_v16 = vld [vmem:[%s4210_s21] sm:$0xf] }
 0x164   : > { %2019 = vmatpush.bf16.msra.mxu1 %v2654_v17  ;;  %v2490_v3 = vor.u32 %v3175_v59, %v2487_v60  ;;  %v3158_v17 = vld [vmem:[%s4210_s21 + $0x14] sm:$0x10]  ;;  %v3133_v59 = vld [vmem:[%s4210_s21 + $0x20] sm:$0x10] }
 0x165   : > { %2032 = vmatpush.bf16.msra.mxu2 %v2846_v21  ;;  %v3155_v21 = vld [vmem:[%s4210_s21 + $0x4] sm:$0xf]  ;;  %v3136_v2 = vor.u32 %v3156_v58, %v3133_v59 }
 0x167   : > { %2053 = vmatpush.bf16.msrb.mxu3 %v2586_v10  ;;  %2007 = vmatpush.bf16.msra.mxu0 %v2438_v32  ;;  %v2463_v10 = vld [vmem:[%s3831_s27 + $0x58] sm:$0xf0]  ;;  %v3128_v32 = vor.u32 %v3155_v21, %v3125_v22  ;;  %v2156_v7 = vsel %vm1770_vm0, %v3136_v2, 0 }
 0x168   : > { %2020 = vmatpush.bf16.msra.mxu1 %v2630_v33  ;;  %v2466_v23 = vor.u32 %v3169_v9, %v2463_v10  ;;  %v3160_v33 = vld [vmem:[%s4210_s21 + $0x24] sm:$0x10] }
 0x169   : > { %2033 = vmatpush.bf16.msra.mxu2 %v2822_v36  ;;  %v2898_v36 = vor.u32 %v3277_v20, %v2895_v24  ;;  %v3140_v44 = vor.u32 %v3160_v33, %v3139_v30  ;;  %v2150_v47 = vsel %vm1770_vm0, %v3128_v32, 0 }
 0x16a   : > { %2008 = vmatmul.bf16.vlgmr.msra.gmra.mxu0 %v3937_v12 }
 0x16b   : > { %2054 = vmatpush.bf16.msrb.mxu3 %v2562_v29  ;;  %2065 = vmatpush.bf16.msrb.mxu0 %v2802_v37  ;;  %v3124_v29 = vor.u32 %v3158_v17, %v3123_v16  ;;  %v3018_v37 = vor.u32 %v3307_v25, %v3015_v26  ;;  %v2159_v52 = vsel %vm1770_vm0, %v3140_v44, 0 }
 0x16c   : > { %2078 = vmatpush.bf16.msrb.mxu1 %v2994_v38  ;;  %2034 = vmatmul.bf16.vlgmr.msra.gmra.mxu2 %v3929_v4  ;;  %v3223_v38 = vld [vmem:[%s3831_s27 + $0x1f4] sm:$0xf] }
 0x16d   : > { %2094 = vmatpush.bf16.msrb.mxu2 %v1790_v39  ;;  %2021 = vmatmul.bf16.vlgmr.msra.gmra.mxu1 %v3939_v13  ;;  %v2679_v39 = vld [vmem:[%s3831_s27 + $0x208] sm:$0xf0] }
 0x16e   : > { %v2682_v46 = vor.u32 %v3223_v38, %v2679_v39 }
 0x16f   : > { %2055 = vmatpush.bf16.msrb.mxu3 %v2538_v43  ;;  %2066 = vmatpush.bf16.msrb.mxu0 %v2778_v54  ;;  %v2147_v43 = vsel %vm1770_vm0, %v3124_v29, 0  ;;  %v3217_v54 = vld [vmem:[%s3831_s27 + $0x1c4] sm:$0xf] }
 0x170   : > { %2079 = vmatpush.bf16.msrb.mxu1 %v2970_v49  ;;  %v2655_v49 = vld [vmem:[%s3831_s27 + $0x1d8] sm:$0xf0] }
 0x171   : > { %2095 = vmatpush.bf16.msrb.mxu2 %v3090_v50  ;;  %v3265_v50 = vld [vmem:[%s3831_s27 + $0x344] sm:$0xf]  ;;  %v2658_v57 = vor.u32 %v3217_v54, %v2655_v49 }
 0x172   : > { %v2850_v60 = vor.u32 %v3265_v50, %v2847_v51 }
 0x173   : > { %2056 = vmatpush.bf16.msrb.mxu3 %v2514_v55  ;;  %2067 = vmatpush.bf16.msrb.mxu0 %v2754_v61  ;;  %v3131_v55 = vld [vmem:[%s4210_s21 + $0x8] sm:$0xf]  ;;  %v3211_v61 = vld [vmem:[%s3831_s27 + $0x194] sm:$0xf] }
 0x174   : > { %2080 = vmatpush.bf16.msrb.mxu1 %v2946_v62  ;;  %v2631_v62 = vld [vmem:[%s3831_s27 + $0x1a8] sm:$0xf0]  ;;  %v3132_v1 = vor.u32 %v3159_v56, %v3131_v55 }
 0x175   : > { %2096 = vmatpush.bf16.msrb.mxu2 %v3066_v63  ;;  %v3259_v63 = vld [vmem:[%s3831_s27 + $0x314] sm:$0xf] }
 0x176   : > { %v2153_v6 = vsel %vm1770_vm0, %v3132_v1, 0 }
 0x177   : > { %2057 = vmatpush.bf16.msrb.mxu3 %v2490_v3  ;;  %2068 = vmatpush.bf16.msrb.mxu0 %v2730_v14  ;;  %v2634_v3 = vor.u32 %v3211_v61, %v2631_v62  ;;  %v1801_v8 = vpop.f32.mrf.mxu0  ;;  %v1814_v9 = vpop.f32.mrf.mxu1 }
 0x178   : > { %2081 = vmatpush.bf16.msrb.mxu1 %v2922_v18  ;;  %v1815_v10 = vadd.f32 %v1814_v9, %v1801_v8 }
 0x179   : > { %2097 = vmatpush.bf16.msrb.mxu2 %v3042_v19 }
 0x17b   : > { %2058 = vmatpush.bf16.msrb.mxu3 %v2466_v23  ;;  %2069 = vmatpush.bf16.msrb.mxu0 %v2706_v31  ;;  %v1827_v14 = vpop.f32.mrf.mxu2 }
 0x17c   : > { %2082 = vmatpush.bf16.msrb.mxu1 %v2898_v36  ;;  %v1840_v15 = vpop.f32.mrf.mxu3  ;;  %v1828_v16 = vadd.f32 %v1827_v14, %v1815_v10 }
 0x17d   : > { %2098 = vmatpush.bf16.msrb.mxu2 %v3018_v37 }
 0x17e   : > { %v4257_v17 = vadd.f32 %v1840_v15, %v1828_v16 }
 0x17f   : > { %2059 = vmatpush.bf16.msrb.mxu3 %v2442_v40  ;;  %2070 = vmatpush.bf16.msrb.mxu0 %v2682_v46  ;;  %v1803_v18 = vpop.f32.mrf.mxu0  ;;  %v1816_v19 = vpop.f32.mrf.mxu1 }
 0x180   : > { %3120 = vmatmul.msk.bf16.vlgmr.msrb.gmra.mxu2 %vm1766_vm2, %v3931_v5  ;;  %2083 = vmatpush.bf16.msrb.mxu1 %v2874_v48  ;;  %v2826_v5 = vor.u32 %v3259_v63, %v2823_v0 }
 0x181   : > { %2171 = vmatpush.bf16.msra.mxu2 %v2147_v43 }
 0x182   : > { %2060 = vmatmul.bf16.vlgmr.msrb.gmra.mxu3 %v3937_v12  ;;  %v705_v12 = vld [vmem:[%s4299_s0] sm:$0x3] }
 0x183   : > { %2184 = vmatpush.bf16.msra.mxu3 %v2150_v47  ;;  %2071 = vmatpush.bf16.msrb.mxu0 %v2658_v57  ;;  %v706_v11 = vpack.c.bf16 %v705_v12, %v705_v12  ;;  %v1829_v20 = vpop.f32.mrf.mxu2 }
 0x184   : > { %2084 = vmatpush.bf16.msrb.mxu1 %v2850_v60  ;;  %v1842_v21 = vpop.f32.mrf.mxu3 }
 0x185   : > { %2223 = vmatpush.bf16.msrb.mxu2 %v2159_v52 }
 0x187   : > { %2236 = vmatpush.bf16.msrb.mxu3 %v2162_v53  ;;  %2072 = vmatpush.bf16.msrb.mxu0 %v2634_v3  ;;  %v2104_v3 = vld [vmem:[%s690_s13] sm:$0x3f] }
 0x188   : > { %2085 = vmatpush.bf16.msrb.mxu1 %v2826_v5  ;;  %v2107_v12 = vperm.slane %v2104_v3, 1  ;;  %v2108_v14 = vperm.slane %v2104_v3, 2  ;;  %v2109_v15 = vperm.slane %v2104_v3, 3 }
 0x18a   : > { %2073 = vmatmul.bf16.vlgmr.msrb.gmra.mxu0 %v3939_v13 }
 0x18b   : > { %2197 = vmatpush.bf16.msra.mxu0 %v2153_v6  ;;  %2086 = vmatmul.bf16.vlgmr.msrb.gmra.mxu1 %v3929_v4 }
 0x18c   : > { %2210 = vmatpush.bf16.msra.mxu1 %v2156_v7  ;;  %v2106_v7 = vperm.slane %v2104_v3, 0 }
 0x18f   : > { %v1892_v4 = vpop.f32.mrf.mxu2 }
 0x190   : > { %3145 = vmatmul.msk.bf16.vlgmr.msra.gmra.mxu2 %vm2142_vm3, %v706_v11 }
 0x191   : > { %v1853_v13 = vpop.f32.mrf.mxu3 }
 0x192   : > { %3146 = vmatmul.msk.bf16.vlgmr.msra.gmra.mxu3 %vm2142_vm3, %v706_v11 }
 0x193   : > { %v1866_v22 = vpop.f32.mrf.mxu0 }
 0x194   : > { %v1867_v24 = vadd.f32 %v1866_v22, %v1853_v13 }
 0x196   : > { %v1879_v23 = vpop.f32.mrf.mxu1 }
 0x197   : > { %v1880_v25 = vadd.f32 %v1879_v23, %v1867_v24  ;;  %v1894_v27 = vpop.f32.mrf.mxu2 }
 0x199   : > { %v1893_v26 = vadd.f32 %v1892_v4, %v1880_v25  ;;  %v1855_v28 = vpop.f32.mrf.mxu3 }
 0x19a   : > { %3147 = vmatmul.msk.bf16.vlgmr.msra.gmra.mxu0 %vm2142_vm3, %v706_v11 }
 0x19b   : > { %3148 = vmatmul.msk.bf16.vlgmr.msra.gmra.mxu1 %vm2142_vm3, %v706_v11  ;;  %v1868_v29 = vpop.f32.mrf.mxu0 }
 0x19e   : > { %v1881_v30 = vpop.f32.mrf.mxu1 }
 0x1a0   : > { %3149 = vmatmul.msk.bf16.vlgmr.msrb.gmra.mxu2 %vm2142_vm3, %v706_v11 }
 0x1a2   : > { %3150 = vmatmul.msk.bf16.vlgmr.msrb.gmra.mxu3 %vm2142_vm3, %v706_v11 }
 0x1aa   : > { %v1944_v31 = vpop.f32.mrf.mxu1 }
 0x1af   : > { %v1905_v32 = vpop.f32.mrf.mxu2 }
 0x1b1   : > { %v1918_v33 = vpop.f32.mrf.mxu3 }
 0x1b2   : > { %v1946_v34 = vpop.f32.mrf.mxu1  ;;  %v1919_v35 = vadd.f32 %v1918_v33, %v1905_v32 }
 0x1b3   : > { %v1931_v36 = vpop.f32.mrf.mxu0 }
 0x1b4   : > { %v1932_v37 = vadd.f32 %v1931_v36, %v1919_v35 }
 0x1b6   : > { %v1945_v38 = vadd.f32 %v1944_v31, %v1932_v37 }
 0x1b7   : > { %v1907_v39 = vpop.f32.mrf.mxu2 }
 0x1b9   : > { %v1920_v40 = vpop.f32.mrf.mxu3 }
 0x1ba   : > { %v2110_v40 = vperm.slane %v2104_v3, 4 }
 0x1bb   : > { %v1933_v41 = vpop.f32.mrf.mxu0 }
 0x1c7   : > { %v1996_v43 = vpop.f32.mrf.mxu0 }
 0x1ca   : > { %v1957_v42 = vpop.f32.mrf.mxu1 }
 0x1cf   : > { %v1970_v44 = vpop.f32.mrf.mxu2  ;;  %v1998_v54 = vpop.f32.mrf.mxu0 }
 0x1d0   : > { %v1971_v45 = vadd.f32 %v1970_v44, %v1957_v42  ;;  %v2111_v42 = vperm.slane %v2104_v3, 5 }
 0x1d1   : > { %v1983_v46 = vpop.f32.mrf.mxu3 }
 0x1d2   : > { %v1959_v47 = vpop.f32.mrf.mxu1  ;;  %v1984_v48 = vadd.f32 %v1983_v46, %v1971_v45 }
 0x1d4   : > { %v1997_v49 = vadd.f32 %v1996_v43, %v1984_v48 }
 0x1d7   : > { %v1972_v50 = vpop.f32.mrf.mxu2 }
 0x1d9   : > { %v1985_v51 = vpop.f32.mrf.mxu3 }
 0x1e5   : > { %v4264_v52 = vpop.f32.mrf.mxu3 }
 0x1e7   : > { %v2009_v53 = vpop.f32.mrf.mxu0 }
 0x1ea   : > { %v2022_v55 = vpop.f32.mrf.mxu1 }
 0x1eb   : > { %v2023_v34 = vadd.f32 %v2022_v55, %v2009_v53 }
 0x1ed   : > { %v2050_v56 = vpop.f32.mrf.mxu3 }
 0x1ef   : > { %v2035_v57 = vpop.f32.mrf.mxu2  ;;  %v2011_v58 = vpop.f32.mrf.mxu0 }
 0x1f0   : > { %v2036_v43 = vadd.f32 %v2035_v57, %v2023_v34 }
 0x1f2   : > { %v2024_v59 = vpop.f32.mrf.mxu1  ;;  %v2049_v54 = vadd.f32 %v4264_v52, %v2036_v43 }
 0x1f7   : > { %v2037_v60 = vpop.f32.mrf.mxu2 }
 0x203   : > { %v2100_v61 = vpop.f32.mrf.mxu2 }
 0x205   : > { %v2061_v62 = vpop.f32.mrf.mxu3 }
 0x207   : > { %v2074_v63 = vpop.f32.mrf.mxu0 }
 0x208   : > { %v2087_v0 = vpop.f32.mrf.mxu1  ;;  %v2075_v30 = vadd.f32 %v2074_v63, %v2061_v62 }
 0x20b   : > { %v2102_v1 = vpop.f32.mrf.mxu2 }
 0x20d   : > { %v2063_v2 = vpop.f32.mrf.mxu3 }
 0x20f   : > { %v2076_v5 = vpop.f32.mrf.mxu0 }
 0x210   : > { %v2089_v6 = vpop.f32.mrf.mxu1 }
 0x213   : > { %v2173_v8 = vpop.f32.mrf.mxu2 }
 0x214   : > { %v2174_v10 = vadd.f32 %v2173_v8, %v2106_v7 }
 0x215   : > { %v2186_v9 = vpop.f32.mrf.mxu3 }
 0x216   : > { %v2187_v11 = vadd.f32 %v2186_v9, %v2107_v12  ;;  %v2263_v19 = vadd.f32 %v2174_v10, %v4257_v17 }
 0x217   : > { %v2199_v18 = vpop.f32.mrf.mxu0 }
 0x218   : > { %v2264_v16 = vadd.f32 %v2187_v11, %v1893_v26  ;;  %v2200_v21 = vadd.f32 %v2199_v18, %v2108_v14  ;;  %v2212_v4 = vpop.f32.mrf.mxu1  ;;  %v2248_v13 = vrot.slane %v2187_v11, 6 }
 0x219   : > { %v2213_v22 = vadd.f32 %v2212_v4, %v2109_v15 }
 0x21a   : > { %v2275_v20 = vrot.slane %v2264_v16, 6  ;;  %v2249_v24 = vrot.slane %v2200_v21, 4  ;;  %v2265_v25 = vadd.f32 %v2200_v21, %v1945_v38  ;;  %v2253_v17 = vsel %vm2252_vm4, %v2174_v10, %v2248_v13 }
 0x21b   : > { %v2175_v27 = vpop.f32.mrf.mxu2  ;;  %v2250_v28 = vrot.slane %v2213_v22, 2  ;;  %v2266_v29 = vadd.f32 %v2213_v22, %v1997_v49  ;;  %v2088_v38 = vadd.f32 %v2087_v0, %v2075_v30 }
 0x21c   : > { %v2279_v23 = vsel %vm2252_vm4, %v2263_v19, %v2275_v20  ;;  %v2276_v31 = vrot.slane %v2265_v25, 4 }
 0x21d   : > { %v2188_v26 = vpop.f32.mrf.mxu3  ;;  %v2255_v32 = vsel %vm2254_vm5, %v2249_v24, %v2250_v28  ;;  %v2277_v33 = vrot.slane %v2266_v29, 2  ;;  %v2101_v46 = vadd.f32 %v2100_v61, %v2088_v38 }
 0x21e   : > { %v2257_v35 = vsel %vm2256_vm6, %v2253_v17, %v2255_v32 }
 0x21f   : > { %v2280_v36 = vsel %vm2254_vm5, %v2276_v31, %v2277_v33  ;;  %v2201_v37 = vpop.f32.mrf.mxu0  ;;  %2261 = vst [vmem:[%s696_s15] sm:$0xff] %v2257_v35 }
 0x220   : > { %v2281_v39 = vsel %vm2256_vm6, %v2279_v23, %v2280_v36  ;;  %v2214_v41 = vpop.f32.mrf.mxu1 }
 0x221   : > { %2285 = vst [vmem:[%s702_s18] sm:$0xff] %v2281_v39 }
 0x223   : > { %v2225_v44 = vpop.f32.mrf.mxu2 }
 0x224   : > { %v2226_v47 = vadd.f32 %v2225_v44, %v2110_v40 }
 0x225   : > { %v2238_v45 = vpop.f32.mrf.mxu3 }
 0x226   : > { %v2239_v48 = vadd.f32 %v2238_v45, %v2111_v42  ;;  %v2267_v51 = vadd.f32 %v2226_v47, %v2049_v54 }
 0x228   : > { %v2251_v49 = vrot.slane %v2239_v48, 6  ;;  %v2268_v50 = vadd.f32 %v2239_v48, %v2101_v46 }
 0x22a   : > { %v2258_v53 = vsel %vm2252_vm4, %v2226_v47, %v2251_v49  ;;  %v2278_v55 = vrot.slane %v2268_v50, 6 }
 0x22b   : > { %2262 = vst [vmem:[%s696_s15 + $0x8] sm:$0xf] %v2258_v53  ;;  %v2227_v58 = vpop.f32.mrf.mxu2 }
 0x22c   : > { %v2282_v56 = vsel %vm2252_vm4, %v2267_v51, %v2278_v55 }
 0x22d   : > { %2286 = vst [vmem:[%s702_s18 + $0x8] sm:$0xf] %v2282_v56  ;;  %v2240_v59 = vpop.f32.mrf.mxu3 }
 0x22e PF: > { %p14_p9 = scmp.ge.s32.totalorder %s3441_s25, 4   ;;  %s4307_s21 = smov %s3382_s22 }
 0x22f   : > { %s4308_s22 = smov %s3450_s28  ;;  %s4309_s23 = smov %s3441_s25 }
 0x230   :  { %16 = sbr.rel (!%p14_p9) target bundleno = 2 (0x2), region = 144 }

// kernel: smplh_forward.3
= control target key start
LH: loop header
LB: loop body
LE: loop exit
PB: predicated region body
PF: predicated region fallthrough
CT: control target
= control target key end

     0   :  { %s672_s12 = smov 0   ;;  %s787_s0 = inlined_call_operand.vmem [shape: bf16[52,512], index: 0, kind: input, shape index: {}]   ;;  %s788_s1 = inlined_call_operand.vmem [shape: f32[2,16,52], index: 1, kind: input, shape index: {}]   ;;  %s789_s2 = inlined_call_operand.vmem [shape: f32[2,3,512], index: 2, kind: input, shape index: {}]   ;;  %s790_s3 = inlined_call_operand.vmem [shape: f32[2,3,512], index: 3, kind: output, shape index: {}]  }
   0x1 LB: > { %s608_s13 = sadd.s32 4294967295, %s650_s12   ;;  %p612_p0 = scmp.ge.s32.totalorder %s650_s12, 1  ;;  %s650_s12 = sphi %s672_s12, %s13_s12  }
   0x2   : > { %p147_p1 = scmp.lt.s32.totalorder %s650_s12, 3 }
   0x4   : > { %p148_p2 = pnand %p612_p0, %p147_p1 }
   0x5   : > { %p700_p3 = scmp.lt.s32.totalorder (!%p148_p2), %s608_s13, 1 }
   0x6   : > { %151 = sbr.rel (%p148_p2) target bundleno = 188 (0xbc), region = 32 }
   0xb   : > { %v205_v0 = vld [vmem:[%s787_s0 + $0x60] sm:$0x33]  ;;  %vm242_vm0 = vcmask 1043456   ;;  %v206_v1 = vld [vmem:[%s787_s0 + $0x68] sm:$0x33]  ;;  %v203_v2 = vld [vmem:[%s787_s0 + $0x50] sm:$0xff] }
   0xc   : > { %v231_v3 = vunpack.c.l.bf16 %v205_v0  ;;  %v232_v4 = vunpack.c.h.bf16 %v205_v0  ;;  %v233_v5 = vunpack.c.l.bf16 %v206_v1  ;;  %v234_v6 = vunpack.c.h.bf16 %v206_v1  ;;  %v204_v7 = vld [vmem:[%s787_s0 + $0x58] sm:$0xff]  ;;  %v201_v8 = vld [vmem:[%s787_s0 + $0x40] sm:$0xff]  ;;  %v202_v9 = vld [vmem:[%s787_s0 + $0x48] sm:$0xff]  ;;  %s793_s13 = smov (!%p700_p3, %s608_s13), 1 }
   0xd   : > { %v227_v10 = vunpack.c.l.bf16 %v203_v2  ;;  %v228_v11 = vunpack.c.h.bf16 %v203_v2  ;;  %v229_v12 = vunpack.c.l.bf16 %v204_v7  ;;  %v230_v13 = vunpack.c.h.bf16 %v204_v7  ;;  %v199_v14 = vld [vmem:[%s787_s0 + $0x30] sm:$0xff]  ;;  %v200_v17 = vld [vmem:[%s787_s0 + $0x38] sm:$0xff]  ;;  %v197_v20 = vld [vmem:[%s787_s0 + $0x20] sm:$0xff]  ;;  %s733_s16 = sshll.u32 %s793_s13, 4 }
   0xe   : > { %619 = vmatpush.msk.msra.mxu0 %vm242_vm0, %v231_v3  ;;  %622 = vmatpush.msk.msra.mxu1 %vm242_vm0, %v232_v4  ;;  %v223_v15 = vunpack.c.l.bf16 %v201_v8  ;;  %v224_v16 = vunpack.c.h.bf16 %v201_v8  ;;  %v225_v18 = vunpack.c.l.bf16 %v202_v9  ;;  %v226_v19 = vunpack.c.h.bf16 %v202_v9  ;;  %v198_v23 = vld [vmem:[%s787_s0 + $0x28] sm:$0xff]  ;;  %v195_v26 = vld [vmem:[%s787_s0 + $0x10] sm:$0xff]  ;;  %v196_v29 = vld [vmem:[%s787_s0 + $0x18] sm:$0xff]  ;;  %s180_s20 = scalar_lea.vmem %s788_s1, %s733_s16  ;;  %s185_s23 = scalar_lea.vmem %s789_s2, %s733_s16 }
   0xf   : > { %625 = vmatpush.msk.msra.mxu2 %vm242_vm0, %v233_v5  ;;  %628 = vmatpush.msk.msra.mxu3 %vm242_vm0, %v234_v6  ;;  %v219_v21 = vunpack.c.l.bf16 %v199_v14  ;;  %v220_v22 = vunpack.c.h.bf16 %v199_v14  ;;  %v221_v24 = vunpack.c.l.bf16 %v200_v17  ;;  %v222_v25 = vunpack.c.h.bf16 %v200_v17  ;;  %v193_v32 = vld [vmem:[%s787_s0] sm:$0xff]  ;;  %v194_v35 = vld [vmem:[%s787_s0 + $0x8] sm:$0xff]  ;;  %s190_s26 = scalar_lea.vmem %s790_s3, %s733_s16 }
  0x10   : > { %265 = vmatpush.msra.mxu0 %v227_v10  ;;  %288 = vmatpush.msra.mxu1 %v228_v11  ;;  %v215_v27 = vunpack.c.l.bf16 %v197_v20  ;;  %v216_v28 = vunpack.c.h.bf16 %v197_v20  ;;  %v217_v30 = vunpack.c.l.bf16 %v198_v23  ;;  %v218_v31 = vunpack.c.h.bf16 %v198_v23  ;;  %v191_v42 = vld [vmem:[%s180_s20] sm:$0xff]  ;;  %v192_v43 = vld [vmem:[%s180_s20 + $0x8] sm:$0xff] }
  0x11   : > { %311 = vmatpush.msra.mxu2 %v229_v12  ;;  %334 = vmatpush.msra.mxu3 %v230_v13  ;;  %v211_v33 = vunpack.c.l.bf16 %v195_v26  ;;  %v212_v34 = vunpack.c.h.bf16 %v195_v26  ;;  %v213_v36 = vunpack.c.l.bf16 %v196_v29  ;;  %v214_v37 = vunpack.c.h.bf16 %v196_v29  ;;  %v347_v44 = vld [vmem:[%s185_s23] sm:$0x77]  ;;  %v746_v60 = vld [vmem:[%s185_s23 + $0x8] sm:$0x77] }
  0x12   : > { %266 = vmatpush.msra.mxu0 %v223_v15  ;;  %289 = vmatpush.msra.mxu1 %v224_v16  ;;  %v207_v38 = vunpack.c.l.bf16 %v193_v32  ;;  %v208_v39 = vunpack.c.h.bf16 %v193_v32  ;;  %v209_v40 = vunpack.c.l.bf16 %v194_v35  ;;  %v210_v41 = vunpack.c.h.bf16 %v194_v35 }
  0x13   : > { %312 = vmatpush.msra.mxu2 %v225_v18  ;;  %335 = vmatpush.msra.mxu3 %v226_v19  ;;  %vm235_vm1 = vcmask 424960   ;;  %v351_v45 = vperm.slane %v347_v44, 0  ;;  %v363_v46 = vperm.slane %v347_v44, 1  ;;  %v391_v47 = vperm.slane %v347_v44, 2 }
  0x14   : > { %267 = vmatpush.msra.mxu0 %v219_v21  ;;  %290 = vmatpush.msra.mxu1 %v220_v22  ;;  %v352_v48 = vperm.slane %v347_v44, 4  ;;  %v364_v49 = vperm.slane %v347_v44, 5  ;;  %v392_v50 = vperm.slane %v347_v44, 6  ;;  %v353_v5 = vperm.slane %v746_v60, 0 }
  0x15   : > { %313 = vmatpush.msra.mxu2 %v221_v24  ;;  %336 = vmatpush.msra.mxu3 %v222_v25  ;;  %v365_v6 = vperm.slane %v746_v60, 1  ;;  %v354_v7 = vperm.slane %v746_v60, 4  ;;  %v393_v13 = vperm.slane %v746_v60, 2  ;;  %v366_v17 = vperm.slane %v746_v60, 5 }
  0x16   : > { %268 = vmatpush.msra.mxu0 %v215_v27  ;;  %291 = vmatpush.msra.mxu1 %v216_v28  ;;  %vm519_vm2 = vcmask 1040384   ;;  %v394_v24 = vperm.slane %v746_v60, 6  ;;  %vm524_vm3 = vcmask 1041408  }
  0x17   : > { %314 = vmatpush.msra.mxu2 %v217_v30  ;;  %337 = vmatpush.msra.mxu3 %v218_v31 }
  0x18   : > { %269 = vmatpush.msra.mxu0 %v211_v33  ;;  %292 = vmatpush.msra.mxu1 %v212_v34 }
  0x19   : > { %315 = vmatpush.msra.mxu2 %v213_v36  ;;  %338 = vmatpush.msra.mxu3 %v214_v37 }
  0x1a   : > { %270 = vmatpush.msra.mxu0 %v207_v38  ;;  %293 = vmatpush.msra.mxu1 %v208_v39 }
  0x1b   : > { %316 = vmatpush.msra.mxu2 %v209_v40  ;;  %339 = vmatpush.msra.mxu3 %v210_v41 }
  0x1c   : > { %620 = vmatmul.msk.f32.vlgmr.msra.gmra.mxu0 %vm235_vm1, %v191_v42  ;;  %623 = vmatmul.msk.f32.vlgmr.msra.gmra.mxu1 %vm235_vm1, %v191_v42 }
  0x1d   : > { %626 = vmatmul.msk.f32.vlgmr.msra.gmra.mxu2 %vm235_vm1, %v191_v42  ;;  %629 = vmatmul.msk.f32.vlgmr.msra.gmra.mxu3 %vm235_vm1, %v191_v42 }
  0x24   : > { %621 = vmatmul.msk.f32.gmra.mxu0 %vm235_vm1, %v192_v43  ;;  %624 = vmatmul.msk.f32.gmra.mxu1 %vm235_vm1, %v192_v43 }
  0x25   : > { %627 = vmatmul.msk.f32.gmra.mxu2 %vm235_vm1, %v192_v43  ;;  %630 = vmatmul.msk.f32.gmra.mxu3 %vm235_vm1, %v192_v43 }
  0x99   : > { %v272_v51 = vpop.f32.mrf.mxu0  ;;  %v295_v52 = vpop.f32.mrf.mxu1 }
  0x9a   : > { %v359_v53 = vmul.f32 %v351_v45, %v272_v51  ;;  %v371_v54 = vmul.f32 %v363_v46, %v272_v51  ;;  %v399_v55 = vmul.f32 %v391_v47, %v272_v51  ;;  %v360_v56 = vmul.f32 %v352_v48, %v295_v52 }
  0x9b   : > { %v372_v57 = vmul.f32 %v364_v49, %v295_v52  ;;  %v400_v58 = vmul.f32 %v392_v50, %v295_v52  ;;  %v424_v1 = vrot.slane %v295_v52, 3  ;;  %v423_v8 = vrot.slane %v272_v51, 3 }
  0x9c   : > { %v379_v59 = vrot.slane %v371_v54, 1  ;;  %v407_v61 = vrot.slane %v399_v55, 2 }
  0x9d   : > { %v380_v62 = vrot.slane %v372_v57, 1  ;;  %v408_v63 = vrot.slane %v400_v58, 2 }
  0x9e   : > { %v387_v0 = vadd.f32 %v379_v59, %v359_v53 }
  0x9f   : > { %v388_v2 = vadd.f32 %v380_v62, %v360_v56 }
  0xa0   : > { %v748_v3 = vpop.f32.mrf.mxu2  ;;  %v750_v4 = vpop.f32.mrf.mxu3  ;;  %v415_v10 = vadd.f32 %v407_v61, %v387_v0 }
  0xa1   : > { %v275_v9 = vpop.f32.mrf.mxu0  ;;  %v298_v11 = vpop.f32.mrf.mxu1  ;;  %v416_v12 = vadd.f32 %v408_v63, %v388_v2  ;;  %v361_v27 = vmul.f32 %v353_v5, %v748_v3  ;;  %v373_v28 = vmul.f32 %v365_v6, %v748_v3  ;;  %v401_v32 = vmul.f32 %v393_v13, %v748_v3 }
  0xa2   : > { %v435_v14 = vmul.f32 %v351_v45, %v275_v9  ;;  %v439_v15 = vmul.f32 %v363_v46, %v275_v9  ;;  %v459_v16 = vmul.f32 %v391_v47, %v275_v9  ;;  %v436_v19 = vmul.f32 %v352_v48, %v298_v11 }
  0xa3   : > { %v432_v18 = vadd.f32 %v424_v1, %v416_v12  ;;  %v440_v20 = vmul.f32 %v364_v49, %v298_v11  ;;  %v460_v23 = vmul.f32 %v392_v50, %v298_v11  ;;  %v431_v25 = vadd.f32 %v423_v8, %v415_v10 }
  0xa4   : > { %v447_v21 = vrot.slane %v439_v15, 1  ;;  %v467_v22 = vrot.slane %v459_v16, 2  ;;  %v483_v30 = vrot.slane %v275_v9, 3  ;;  %v484_v34 = vrot.slane %v298_v11, 3 }
  0xa5   : > { %v448_v26 = vrot.slane %v440_v20, 1  ;;  %v468_v31 = vrot.slane %v460_v23, 2  ;;  %v500_v35 = vrot.slane %v432_v18, 3  ;;  %v381_v36 = vrot.slane %v373_v28, 1 }
  0xa6   : > { %v455_v29 = vadd.f32 %v447_v21, %v435_v14  ;;  %v362_v39 = vmul.f32 %v354_v7, %v750_v4  ;;  %v374_v40 = vmul.f32 %v366_v17, %v750_v4  ;;  %v402_v41 = vmul.f32 %v394_v24, %v750_v4 }
  0xa7   : > { %v456_v33 = vadd.f32 %v448_v26, %v436_v19  ;;  %v409_v43 = vrot.slane %v401_v32, 2  ;;  %v389_v47 = vadd.f32 %v381_v36, %v361_v27  ;;  %v426_v51 = vrot.slane %v750_v4, 3 }
  0xa8   : > { %v475_v37 = vadd.f32 %v467_v22, %v455_v29  ;;  %v321_v38 = vpop.f32.mrf.mxu2  ;;  %v344_v49 = vpop.f32.mrf.mxu3  ;;  %v382_v50 = vrot.slane %v374_v40, 1  ;;  %v499_v54 = vrot.slane %v431_v25, 3  ;;  %v410_v57 = vrot.slane %v402_v41, 2 }
  0xa9   : > { %v476_v42 = vadd.f32 %v468_v31, %v456_v33  ;;  %v437_v44 = vmul.f32 %v353_v5, %v321_v38  ;;  %v441_v45 = vmul.f32 %v365_v6, %v321_v38  ;;  %v461_v48 = vmul.f32 %v393_v13, %v321_v38 }
  0xaa   : > { %v491_v46 = vadd.f32 %v483_v30, %v475_v37  ;;  %v390_v56 = vadd.f32 %v382_v50, %v362_v39  ;;  %v442_v62 = vmul.f32 %v366_v17, %v344_v49  ;;  %v521_v63 = vsel %vm519_vm2, %v432_v18, %v500_v35 }
  0xab   : > { %v492_v52 = vadd.f32 %v484_v34, %v476_v42  ;;  %v449_v53 = vrot.slane %v441_v45, 1  ;;  %v469_v55 = vrot.slane %v461_v48, 2  ;;  %v417_v0 = vadd.f32 %v409_v43, %v389_v47 }
  0xac   : > { %v511_v58 = vrot.slane %v491_v46, 6  ;;  %v418_v1 = vadd.f32 %v410_v57, %v390_v56  ;;  %v462_v2 = vmul.f32 %v394_v24, %v344_v49  ;;  %v438_v6 = vmul.f32 %v354_v7, %v344_v49 }
  0xad   : > { %v512_v59 = vrot.slane %v492_v52, 6  ;;  %v457_v61 = vadd.f32 %v449_v53, %v437_v44  ;;  %v450_v8 = vrot.slane %v442_v62, 1  ;;  %v425_v9 = vrot.slane %v748_v3, 3 }
  0xae   : > { %v520_v10 = vsel %vm519_vm2, %v431_v25, %v499_v54  ;;  %v434_v12 = vadd.f32 %v426_v51, %v418_v1  ;;  %v485_v14 = vrot.slane %v321_v38, 3  ;;  %v470_v16 = vrot.slane %v462_v2, 2 }
  0xaf   : > { %v526_v5 = vsel %vm524_vm3, %v521_v63, %v512_v59  ;;  %v477_v4 = vadd.f32 %v469_v55, %v457_v61  ;;  %v525_v13 = vsel %vm524_vm3, %v520_v10, %v511_v58  ;;  %v458_v15 = vadd.f32 %v450_v8, %v438_v6 }
  0xb0   : > { %v533_v11 = vrot.slane %v526_v5, 4  ;;  %v433_v60 = vadd.f32 %v425_v9, %v417_v0  ;;  %v486_v19 = vrot.slane %v344_v49, 3  ;;  %v502_v20 = vrot.slane %v434_v12, 3 }
  0xb1   : > { %v493_v7 = vadd.f32 %v485_v14, %v477_v4  ;;  %v478_v18 = vadd.f32 %v470_v16, %v458_v15 }
  0xb2   : > { %v535_v17 = vsel %vm242_vm0, %v525_v13, %v533_v11  ;;  %v501_v22 = vrot.slane %v433_v60, 3  ;;  %v523_v24 = vsel %vm519_vm2, %v434_v12, %v502_v20 }
  0xb3   : > { %539 = vst [vmem:[%s190_s26] sm:$0x77] %v535_v17  ;;  %v494_v21 = vadd.f32 %v486_v19, %v478_v18  ;;  %v513_v3 = vrot.slane %v493_v7, 6 }
  0xb4   : > { %v522_v26 = vsel %vm519_vm2, %v433_v60, %v501_v22 }
  0xb5   : > { %v514_v23 = vrot.slane %v494_v21, 6  ;;  %v527_v28 = vsel %vm524_vm3, %v522_v26, %v513_v3 }
  0xb7   : > { %v528_v25 = vsel %vm524_vm3, %v523_v24, %v514_v23 }
  0xb8   : > { %v534_v27 = vrot.slane %v528_v25, 4 }
  0xba   : > { %v536_v29 = vsel %vm242_vm0, %v527_v28, %v534_v27 }
  0xbb   : > { %540 = vst [vmem:[%s190_s26 + $0x8] sm:$0x77] %v536_v29 }
  0xbc PF: > { %s13_s12 = sadd.s32 1, %s650_s12  }
  0xbd   : > { %p10_p4 = scmp.ge.s32.totalorder %s13_s12, 4  }
  0xbf   :  { %12 = sbr.rel (!%p10_p4) target bundleno = 1 (0x1), region = 65 }

</bundles_post_ra>
